<compile_context>
chip_gen: v5e
topology: v5e:2x2
jax: 0.10.0
libtpu: 0.0.40
codegen_flags: <defaults>
</compile_context>

<pallas_src>
import jax
import jax.numpy as jnp
from jax.experimental import pallas as pl
from jax.experimental.pallas import tpu as pltpu

TEXT_DIM = 24
DENSENET_DIM = (8, 16, 32)
HIDDEN_SIZE = 48
NUM_CLASSES = 5
VOCAB = 100

C = 3 * DENSENET_DIM[2]   # num_mmc_units = 96
CP = 128                  # channel / feature dim zero-padded to a full 128-lane vreg
H2 = HIDDEN_SIZE * 2      # 96
SP = 12                   # feat_high spatial size (12x12)
PO = 6                    # pooled spatial size (6x6)
TB = 8                    # images per grid step (one (8,128) f32 tile per batch block)


# ----------------------------------------------------------------------------
# Fused kernel: MultiplicationFusion (product) + BN + 3x(1x1 conv, ReLU)
#               + folded AvgPool + Classifier (Linear, GELU, LayerNorm, Linear)
# One grid step processes TB images; all intermediates stay in VMEM / vregs.
# ----------------------------------------------------------------------------
def _fused_kernel(txt_ref, col_ref, wconv_ref, wcls_ref, vec_ref, o_ref):
    f32 = jnp.float32
    bf16 = jnp.bfloat16
    tb = txt_ref.shape[0]

    vec = vec_ref[...]                       # (16, 128) f32 packed vectors
    txt = txt_ref[...]                       # (TB, 128)  tiled text, pad lanes zero

    # MultiplicationFusion: mm[b,c,i,j] = txt_tiled[b,c] * sum_k img_tiled[b,c,k,j]
    # (constant over i).  The wrapper supplies the k-reduced column sums; stack the
    # 12 spatial columns j-major on the sublane axis so every matmul below is one
    # lane-dense (12*TB, 128) dot.
    x = jnp.concatenate([txt * col_ref[j] for j in range(SP)], axis=0)   # (12*TB, 128)

    # BatchNorm2d (eval mode, folded per-channel scale/shift)
    x = x * vec[0:1] + vec[1:2]

    # 3 x (1x1 Conv + ReLU): (12*TB,128)@(128,128) bf16 MXU matmuls, f32 accumulation
    for i in range(3):
        x = jnp.dot(x.astype(bf16), wconv_ref[i], preferred_element_type=f32)
        x = jnp.maximum(x + vec[2 + i:3 + i], 0.0)

    # AdaptiveAvgPool2d((6,6)) + flatten + Linear(3456 -> 96): the exact 2x2 column mean
    # and the constant-row structure are pre-folded into wcls at init, so this is 12
    # K-accumulated (TB,128)@(128,128) dots with a lane-dense (128-padded) output.
    h = jnp.zeros((tb, CP), f32)
    for j in range(SP):
        xj = x[j * tb:(j + 1) * tb, :]       # tile-aligned static slice (TB=8 rows)
        h = h + jnp.dot(xj.astype(bf16), wcls_ref[j], preferred_element_type=f32)
    h = h + vec[5:6]                         # fb1 (pad lanes zero)

    # GELU.  TODO(synk): the repo's custom GELU class is unspecified; BERT-style tanh
    # approximation used (exact-erf form differs at ~1e-3 level).
    k0 = 0.7978845608028654                  # sqrt(2/pi)
    h = 0.5 * h * (1.0 + jnp.tanh(k0 * (h + 0.044715 * h * h * h)))

    # FusedLayerNorm(hidden_size*2 = 96, eps=1e-12): pad lanes of h are exactly zero
    # (wcls out-cols >= 96 are zero, fb1 pad zero, GELU(0)=0), so sums over the 128-wide
    # row divided by 96 are the exact statistics over the real 96 features.
    mu = jnp.sum(h, axis=-1, keepdims=True) * (1.0 / H2)
    var = jnp.sum(h * h, axis=-1, keepdims=True) * (1.0 / H2) - mu * mu
    h = (h - mu) * jax.lax.rsqrt(var + 1e-12)
    h = h * vec[6:7] + vec[7:8]              # gamma/beta (gamma zero on pad lanes)

    # Final Linear(96 -> num_classes), padded to 128 output lanes -> unmasked vst slab
    o_ref[...] = jnp.dot(h.astype(bf16), wconv_ref[3], preferred_element_type=f32) + vec[8:9]


def fused_chartfc(txt_p, col, p, tb):
    """txt_p: (Bp, 128) tiled text; col: (12, Bp, 128) j-major k-reduced fused image."""
    bp = txt_p.shape[0]
    grid = (bp // tb,)
    return pl.pallas_call(
        _fused_kernel,
        out_shape=jax.ShapeDtypeStruct((bp, CP), jnp.float32),
        grid=grid,
        in_specs=[
            pl.BlockSpec((tb, CP), lambda g: (g, 0)),          # txt (per TB-batch block)
            pl.BlockSpec((SP, tb, CP), lambda g: (0, g, 0)),   # column sums (per block)
            pl.BlockSpec((4, CP, CP), lambda g: (0, 0, 0)),    # conv1-3 + final linear (bf16)
            pl.BlockSpec((SP, CP, CP), lambda g: (0, 0, 0)),   # pool-folded classifier (bf16)
            pl.BlockSpec((16, CP), lambda g: (0, 0)),          # packed vectors (f32)
        ],
        out_specs=pl.BlockSpec((tb, CP), lambda g: (g, 0)),
        compiler_params=pltpu.CompilerParams(dimension_semantics=("parallel",)),
    )(txt_p, col, p["wconv"], p["wcls"], p["vec"])


# ----------------------------------------------------------------------------
# Full forward: encoder stubs + layout prep in plain JAX, fused Pallas kernel
# ----------------------------------------------------------------------------
def chartfc_forward(params, img, txt_ids):
    B = img.shape[0]

    # --- BertEncoder(claim): TODO(synk) pretrained BERT replaced by embedding + mean pool
    emb = params["txt_embed"][txt_ids]                        # (B, T, TEXT_DIM)
    txt_feat = jnp.mean(emb, axis=1)                          # (B, 24)

    # --- ImageEncoder: TODO(synk) DenseNet replaced by deterministic 1x1-projection stub
    feat_low = jnp.einsum("oc,bchw->bohw", params["img_w_low"], img)       # (B, 8, 24, 24)
    fh = jnp.einsum("oc,bchw->bohw", params["img_w_high"], img)            # (B, 32, 24, 24)
    feat_high = fh.reshape(B, DENSENET_DIM[2], SP, 2, SP, 2).mean(axis=(3, 5))  # (B,32,12,12)

    # --- maxpool_low: result unused in the use_ocr=False branch (DCE'd under jit)
    _ = jax.lax.reduce_window(feat_low, -jnp.inf, jax.lax.max,
                              (1, 1, 3, 3), (1, 1, 2, 2),
                              ((0, 0), (0, 0), (1, 1), (1, 1)))

    # --- MultiplicationFusion layout prep (XLA fuses this into the stubs above):
    #   txt_tiled[b,c] = txt_feat[b, c % 24] (tile 4x);  img_tiled[b,c] = feat_high[b, c % 32]
    #   mm[b,c,i,j]    = txt_tiled[b,c] * sum_k img_tiled[b,c,k,j]   (constant over i)
    # so the kernel only needs the k-reduced column sums: channels-last, zero-padded to a
    # full 128-lane vreg, spatial column (j) major -> ~12x less kernel input HBM traffic.
    txt_t = jnp.tile(txt_feat, (1, 4))                                   # (B, 96), c -> c % 24
    txt_p = jnp.pad(txt_t, ((0, 0), (0, CP - C)))                        # (B, 128)

    col = jnp.sum(feat_high, axis=2)                                     # (B, 32, 12)  sum over k
    col = jnp.transpose(col, (2, 0, 1))                                  # (12, B, 32)  j-major
    col = jnp.tile(col, (1, 1, 3))                                       # (12, B, 96), c -> c % 32
    col = jnp.pad(col, ((0, 0), (0, 0), (0, CP - C)))                    # (12, B, 128)

    # Pad batch to a multiple of TB so every grid step is a full, tile-aligned block
    # (padded batch rows are sliced off below; grid stays >= 2 for B >= 2*TB on v7x).
    G = max(1, -(-B // TB))
    Bp = G * TB
    txt_p = jnp.pad(txt_p, ((0, Bp - B), (0, 0)))
    col = jnp.pad(col, ((0, 0), (0, Bp - B), (0, 0)))

    out = fused_chartfc(txt_p, col, params, TB)                          # (Bp, 128)
    return out[:B, :NUM_CLASSES]


# ----------------------------------------------------------------------------
# Deterministic synthetic parameters (module-faithful shapes, packed to kernel layout)
# ----------------------------------------------------------------------------
def init_params(key):
    ks = jax.random.split(key, 16)
    flat = PO * PO * H2   # 6*6*96 = 3456

    def nrm(k, shape, scale=0.05):
        return scale * jax.random.normal(k, shape, jnp.float32)

    # BatchNorm2d (eval mode) folded into per-channel scale/shift
    gamma = 1.0 + nrm(ks[0], (C,), 0.1)
    beta = nrm(ks[1], (C,), 0.1)
    r_mean = nrm(ks[2], (C,), 0.1)
    r_var = 1.0 + 0.5 * jax.nn.sigmoid(jax.random.normal(ks[3], (C,)))
    bn_scale = gamma / jnp.sqrt(r_var + 1e-5)
    bn_shift = beta - r_mean * bn_scale

    # 1x1 conv weights stored pre-transposed as (in, out); synthetic init.
    cw = [nrm(ks[7 + i], (C, C)) for i in range(3)]
    cb = [nrm(ks[10 + i], (C,)) for i in range(3)]

    # Classifier Linear(3456 -> 96), stored (in, out) (== torch weight transposed).
    # The fused feature map is constant along the pooled-row axis (oh) and the 6x6
    # adaptive pool on 12x12 is an exact 2x2 mean, so fold both into the weight:
    #   Wfold[j, c, :] = 0.5 * sum_oh fw1[c*36 + oh*6 + j//2, :]
    #   h[b] = sum_j x_col[b, j, :] @ Wfold[j]
    fw1 = nrm(ks[13], (flat, H2))
    w_ow = fw1.reshape(C, PO, PO, H2).sum(axis=1)             # (c, ow, out): sum over oh
    wfold = 0.5 * w_ow[:, jnp.repeat(jnp.arange(PO), 2), :]   # (c, 12, out)
    wfold = jnp.transpose(wfold, (1, 0, 2))                   # (12, c, out)
    wfold = jnp.pad(wfold, ((0, 0), (0, CP - C), (0, CP - H2))).astype(jnp.bfloat16)

    fb1 = nrm(ks[14], (H2,))
    fw2 = nrm(ks[15], (H2, NUM_CLASSES))                      # final Linear(96 -> 5), (in,out)
    fw2p = jnp.pad(fw2, ((0, CP - H2), (0, CP - NUM_CLASSES)))

    # Pack matmul weights (bf16): [conv1, conv2, conv3, final linear], each zero-padded.
    wconv = jnp.stack(
        [jnp.pad(w, ((0, CP - C), (0, CP - C))) for w in cw] + [fw2p]
    ).astype(jnp.bfloat16)                                    # (4, 128, 128)

    # Pack per-channel / per-feature vectors (f32) into one (16, 128) slab; pad lanes 0.
    vec = jnp.zeros((16, CP), jnp.float32)
    rows = [bn_scale, bn_shift, cb[0], cb[1], cb[2], fb1,
            jnp.ones((H2,), jnp.float32),                     # LN gamma (pad lanes -> 0)
            jnp.zeros((H2,), jnp.float32),                    # LN beta
            jnp.zeros((NUM_CLASSES,), jnp.float32)]           # fb2
    for i, r in enumerate(rows):
        vec = vec.at[i, :r.shape[0]].set(r)

    return dict(
        txt_embed=nrm(ks[4], (VOCAB, TEXT_DIM), 0.2),
        img_w_low=nrm(ks[5], (DENSENET_DIM[0], 3), 0.2),
        img_w_high=nrm(ks[6], (DENSENET_DIM[2], 3), 0.2),
        wconv=wconv, wcls=wfold, vec=vec,
    )


if __name__ == "__main__":
    key = jax.random.PRNGKey(0)
    kp, ki, kt = jax.random.split(key, 3)
    params = init_params(kp)
    img = jax.random.normal(ki, (2, 3, 24, 24), jnp.float32)   # NCHW chart image
    txt_ids = jax.random.randint(kt, (2, 8), 0, VOCAB)         # token ids (claim text)

    fwd = jax.jit(chartfc_forward)
    out = fwd(params, img, txt_ids)
    jax.block_until_ready(out)
    assert out.shape == (2, NUM_CLASSES) and out.dtype == jnp.float32
    print("KERNEL_OK")
</pallas_src>

<mosaic_0001>
module attributes {stable_mosaic.version = 11 : i64} {
  func.func @_fused_kernel(%arg0: i32, %arg1: memref<8x128xf32, #tpu.memory_space<vmem>>, %arg2: memref<12x8x128xf32, #tpu.memory_space<vmem>>, %arg3: memref<4x128x128xbf16, #tpu.memory_space<vmem>>, %arg4: memref<12x128x128xbf16, #tpu.memory_space<vmem>>, %arg5: memref<16x128xf32, #tpu.memory_space<vmem>>, %arg6: memref<8x128xf32, #tpu.memory_space<vmem>>) attributes {dimension_semantics = [#tpu.dimension_semantics<parallel>], iteration_bounds = array<i64: 1>, scalar_prefetch = 0 : i64, scratch_operands = 0 : i64, tpu.core_type = #tpu.core_type<tc>, window_params = [{transform_indices = @transform_0, window_bounds = array<i64: 8, 128>}, {transform_indices = @transform_1, window_bounds = array<i64: 12, 8, 128>}, {pipeline_mode = #tpu.pipeline_mode<synchronous>, transform_indices = @transform_2, window_bounds = array<i64: 4, 128, 128>}, {pipeline_mode = #tpu.pipeline_mode<synchronous>, transform_indices = @transform_3, window_bounds = array<i64: 12, 128, 128>}, {pipeline_mode = #tpu.pipeline_mode<synchronous>, transform_indices = @transform_4, window_bounds = array<i64: 16, 128>}, {transform_indices = @transform_5, window_bounds = array<i64: 8, 128>}]} {
    %c0 = arith.constant 0 : index
    %c0_0 = arith.constant 0 : index
    %0 = vector.load %arg5[%c0, %c0_0] : memref<16x128xf32, #tpu.memory_space<vmem>>, vector<16x128xf32>
    %c0_1 = arith.constant 0 : index
    %c0_2 = arith.constant 0 : index
    %1 = vector.load %arg1[%c0_1, %c0_2] : memref<8x128xf32, #tpu.memory_space<vmem>>, vector<8x128xf32>
    %c0_3 = arith.constant 0 : index
    %c0_4 = arith.constant 0 : index
    %c0_5 = arith.constant 0 : index
    %2 = vector.load %arg2[%c0_3, %c0_4, %c0_5] : memref<12x8x128xf32, #tpu.memory_space<vmem>>, vector<1x8x128xf32>
    %3 = vector.shape_cast %2 : vector<1x8x128xf32> to vector<8x128xf32>
    %4 = arith.mulf %1, %3 : vector<8x128xf32>
    %c1 = arith.constant 1 : index
    %c0_6 = arith.constant 0 : index
    %c0_7 = arith.constant 0 : index
    %5 = vector.load %arg2[%c1, %c0_6, %c0_7] : memref<12x8x128xf32, #tpu.memory_space<vmem>>, vector<1x8x128xf32>
    %6 = vector.shape_cast %5 : vector<1x8x128xf32> to vector<8x128xf32>
    %7 = arith.mulf %1, %6 : vector<8x128xf32>
    %c2 = arith.constant 2 : index
    %c0_8 = arith.constant 0 : index
    %c0_9 = arith.constant 0 : index
    %8 = vector.load %arg2[%c2, %c0_8, %c0_9] : memref<12x8x128xf32, #tpu.memory_space<vmem>>, vector<1x8x128xf32>
    %9 = vector.shape_cast %8 : vector<1x8x128xf32> to vector<8x128xf32>
    %10 = arith.mulf %1, %9 : vector<8x128xf32>
    %c3 = arith.constant 3 : index
    %c0_10 = arith.constant 0 : index
    %c0_11 = arith.constant 0 : index
    %11 = vector.load %arg2[%c3, %c0_10, %c0_11] : memref<12x8x128xf32, #tpu.memory_space<vmem>>, vector<1x8x128xf32>
    %12 = vector.shape_cast %11 : vector<1x8x128xf32> to vector<8x128xf32>
    %13 = arith.mulf %1, %12 : vector<8x128xf32>
    %c4 = arith.constant 4 : index
    %c0_12 = arith.constant 0 : index
    %c0_13 = arith.constant 0 : index
    %14 = vector.load %arg2[%c4, %c0_12, %c0_13] : memref<12x8x128xf32, #tpu.memory_space<vmem>>, vector<1x8x128xf32>
    %15 = vector.shape_cast %14 : vector<1x8x128xf32> to vector<8x128xf32>
    %16 = arith.mulf %1, %15 : vector<8x128xf32>
    %c5 = arith.constant 5 : index
    %c0_14 = arith.constant 0 : index
    %c0_15 = arith.constant 0 : index
    %17 = vector.load %arg2[%c5, %c0_14, %c0_15] : memref<12x8x128xf32, #tpu.memory_space<vmem>>, vector<1x8x128xf32>
    %18 = vector.shape_cast %17 : vector<1x8x128xf32> to vector<8x128xf32>
    %19 = arith.mulf %1, %18 : vector<8x128xf32>
    %c6 = arith.constant 6 : index
    %c0_16 = arith.constant 0 : index
    %c0_17 = arith.constant 0 : index
    %20 = vector.load %arg2[%c6, %c0_16, %c0_17] : memref<12x8x128xf32, #tpu.memory_space<vmem>>, vector<1x8x128xf32>
    %21 = vector.shape_cast %20 : vector<1x8x128xf32> to vector<8x128xf32>
    %22 = arith.mulf %1, %21 : vector<8x128xf32>
    %c7 = arith.constant 7 : index
    %c0_18 = arith.constant 0 : index
    %c0_19 = arith.constant 0 : index
    %23 = vector.load %arg2[%c7, %c0_18, %c0_19] : memref<12x8x128xf32, #tpu.memory_space<vmem>>, vector<1x8x128xf32>
    %24 = vector.shape_cast %23 : vector<1x8x128xf32> to vector<8x128xf32>
    %25 = arith.mulf %1, %24 : vector<8x128xf32>
    %c8 = arith.constant 8 : index
    %c0_20 = arith.constant 0 : index
    %c0_21 = arith.constant 0 : index
    %26 = vector.load %arg2[%c8, %c0_20, %c0_21] : memref<12x8x128xf32, #tpu.memory_space<vmem>>, vector<1x8x128xf32>
    %27 = vector.shape_cast %26 : vector<1x8x128xf32> to vector<8x128xf32>
    %28 = arith.mulf %1, %27 : vector<8x128xf32>
    %c9 = arith.constant 9 : index
    %c0_22 = arith.constant 0 : index
    %c0_23 = arith.constant 0 : index
    %29 = vector.load %arg2[%c9, %c0_22, %c0_23] : memref<12x8x128xf32, #tpu.memory_space<vmem>>, vector<1x8x128xf32>
    %30 = vector.shape_cast %29 : vector<1x8x128xf32> to vector<8x128xf32>
    %31 = arith.mulf %1, %30 : vector<8x128xf32>
    %c10 = arith.constant 10 : index
    %c0_24 = arith.constant 0 : index
    %c0_25 = arith.constant 0 : index
    %32 = vector.load %arg2[%c10, %c0_24, %c0_25] : memref<12x8x128xf32, #tpu.memory_space<vmem>>, vector<1x8x128xf32>
    %33 = vector.shape_cast %32 : vector<1x8x128xf32> to vector<8x128xf32>
    %34 = arith.mulf %1, %33 : vector<8x128xf32>
    %c11 = arith.constant 11 : index
    %c0_26 = arith.constant 0 : index
    %c0_27 = arith.constant 0 : index
    %35 = vector.load %arg2[%c11, %c0_26, %c0_27] : memref<12x8x128xf32, #tpu.memory_space<vmem>>, vector<1x8x128xf32>
    %36 = vector.shape_cast %35 : vector<1x8x128xf32> to vector<8x128xf32>
    %37 = arith.mulf %1, %36 : vector<8x128xf32>
    %38 = tpu.concatenate %4, %7, %10, %13, %16, %19, %22, %25, %28, %31, %34, %37 in 0 : vector<8x128xf32>, vector<8x128xf32>, vector<8x128xf32>, vector<8x128xf32>, vector<8x128xf32>, vector<8x128xf32>, vector<8x128xf32>, vector<8x128xf32>, vector<8x128xf32>, vector<8x128xf32>, vector<8x128xf32>, vector<8x128xf32> -> vector<96x128xf32>
    %39 = vector.extract_strided_slice %0 {offsets = [0, 0], sizes = [1, 128], strides = [1, 1]} : vector<16x128xf32> to vector<1x128xf32>
    %40 = vector.broadcast %39 : vector<1x128xf32> to vector<96x128xf32>
    %41 = arith.mulf %38, %40 : vector<96x128xf32>
    %42 = vector.extract_strided_slice %0 {offsets = [1, 0], sizes = [1, 128], strides = [1, 1]} : vector<16x128xf32> to vector<1x128xf32>
    %43 = vector.broadcast %42 : vector<1x128xf32> to vector<96x128xf32>
    %44 = arith.addf %41, %43 : vector<96x128xf32>
    %45 = arith.truncf %44 : vector<96x128xf32> to vector<96x128xbf16>
    %c0_28 = arith.constant 0 : index
    %c0_29 = arith.constant 0 : index
    %c0_30 = arith.constant 0 : index
    %46 = vector.load %arg3[%c0_28, %c0_29, %c0_30] : memref<4x128x128xbf16, #tpu.memory_space<vmem>>, vector<1x128x128xbf16>
    %47 = vector.shape_cast %46 : vector<1x128x128xbf16> to vector<128x128xbf16>
    %cst = arith.constant dense<0.000000e+00> : vector<96x128xf32>
    %48 = tpu.matmul %45, %47, %cst {dimension_numbers = #tpu.dot_dimension_numbers<[1], [0], [0], [1], [0, 0, 1, 1], [], []>} : vector<96x128xbf16>, vector<128x128xbf16>, vector<96x128xf32> -> vector<96x128xf32>
    %49 = vector.extract_strided_slice %0 {offsets = [2, 0], sizes = [1, 128], strides = [1, 1]} : vector<16x128xf32> to vector<1x128xf32>
    %50 = vector.broadcast %49 : vector<1x128xf32> to vector<96x128xf32>
    %51 = arith.addf %48, %50 : vector<96x128xf32>
    %cst_31 = arith.constant 0.000000e+00 : f32
    %52 = vector.broadcast %cst_31 : f32 to vector<96x128xf32>
    %53 = arith.maximumf %51, %52 : vector<96x128xf32>
    %54 = arith.truncf %53 : vector<96x128xf32> to vector<96x128xbf16>
    %c1_32 = arith.constant 1 : index
    %c0_33 = arith.constant 0 : index
    %c0_34 = arith.constant 0 : index
    %55 = vector.load %arg3[%c1_32, %c0_33, %c0_34] : memref<4x128x128xbf16, #tpu.memory_space<vmem>>, vector<1x128x128xbf16>
    %56 = vector.shape_cast %55 : vector<1x128x128xbf16> to vector<128x128xbf16>
    %cst_35 = arith.constant dense<0.000000e+00> : vector<96x128xf32>
    %57 = tpu.matmul %54, %56, %cst_35 {dimension_numbers = #tpu.dot_dimension_numbers<[1], [0], [0], [1], [0, 0, 1, 1], [], []>} : vector<96x128xbf16>, vector<128x128xbf16>, vector<96x128xf32> -> vector<96x128xf32>
    %58 = vector.extract_strided_slice %0 {offsets = [3, 0], sizes = [1, 128], strides = [1, 1]} : vector<16x128xf32> to vector<1x128xf32>
    %59 = vector.broadcast %58 : vector<1x128xf32> to vector<96x128xf32>
    %60 = arith.addf %57, %59 : vector<96x128xf32>
    %cst_36 = arith.constant 0.000000e+00 : f32
    %61 = vector.broadcast %cst_36 : f32 to vector<96x128xf32>
    %62 = arith.maximumf %60, %61 : vector<96x128xf32>
    %63 = arith.truncf %62 : vector<96x128xf32> to vector<96x128xbf16>
    %c2_37 = arith.constant 2 : index
    %c0_38 = arith.constant 0 : index
    %c0_39 = arith.constant 0 : index
    %64 = vector.load %arg3[%c2_37, %c0_38, %c0_39] : memref<4x128x128xbf16, #tpu.memory_space<vmem>>, vector<1x128x128xbf16>
    %65 = vector.shape_cast %64 : vector<1x128x128xbf16> to vector<128x128xbf16>
    %cst_40 = arith.constant dense<0.000000e+00> : vector<96x128xf32>
    %66 = tpu.matmul %63, %65, %cst_40 {dimension_numbers = #tpu.dot_dimension_numbers<[1], [0], [0], [1], [0, 0, 1, 1], [], []>} : vector<96x128xbf16>, vector<128x128xbf16>, vector<96x128xf32> -> vector<96x128xf32>
    %67 = vector.extract_strided_slice %0 {offsets = [4, 0], sizes = [1, 128], strides = [1, 1]} : vector<16x128xf32> to vector<1x128xf32>
    %68 = vector.broadcast %67 : vector<1x128xf32> to vector<96x128xf32>
    %69 = arith.addf %66, %68 : vector<96x128xf32>
    %cst_41 = arith.constant 0.000000e+00 : f32
    %70 = vector.broadcast %cst_41 : f32 to vector<96x128xf32>
    %71 = arith.maximumf %69, %70 : vector<96x128xf32>
    %cst_42 = arith.constant 0.000000e+00 : f32
    %72 = vector.broadcast %cst_42 : f32 to vector<8x128xf32>
    %73 = vector.extract_strided_slice %71 {offsets = [0, 0], sizes = [8, 128], strides = [1, 1]} : vector<96x128xf32> to vector<8x128xf32>
    %74 = arith.truncf %73 : vector<8x128xf32> to vector<8x128xbf16>
    %c0_43 = arith.constant 0 : index
    %c0_44 = arith.constant 0 : index
    %c0_45 = arith.constant 0 : index
    %75 = vector.load %arg4[%c0_43, %c0_44, %c0_45] : memref<12x128x128xbf16, #tpu.memory_space<vmem>>, vector<1x128x128xbf16>
    %76 = vector.shape_cast %75 : vector<1x128x128xbf16> to vector<128x128xbf16>
    %cst_46 = arith.constant dense<0.000000e+00> : vector<8x128xf32>
    %77 = tpu.matmul %74, %76, %cst_46 {dimension_numbers = #tpu.dot_dimension_numbers<[1], [0], [0], [1], [0, 0, 1, 1], [], []>} : vector<8x128xbf16>, vector<128x128xbf16>, vector<8x128xf32> -> vector<8x128xf32>
    %78 = arith.addf %72, %77 : vector<8x128xf32>
    %79 = vector.extract_strided_slice %71 {offsets = [8, 0], sizes = [8, 128], strides = [1, 1]} : vector<96x128xf32> to vector<8x128xf32>
    %80 = arith.truncf %79 : vector<8x128xf32> to vector<8x128xbf16>
    %c1_47 = arith.constant 1 : index
    %c0_48 = arith.constant 0 : index
    %c0_49 = arith.constant 0 : index
    %81 = vector.load %arg4[%c1_47, %c0_48, %c0_49] : memref<12x128x128xbf16, #tpu.memory_space<vmem>>, vector<1x128x128xbf16>
    %82 = vector.shape_cast %81 : vector<1x128x128xbf16> to vector<128x128xbf16>
    %cst_50 = arith.constant dense<0.000000e+00> : vector<8x128xf32>
    %83 = tpu.matmul %80, %82, %cst_50 {dimension_numbers = #tpu.dot_dimension_numbers<[1], [0], [0], [1], [0, 0, 1, 1], [], []>} : vector<8x128xbf16>, vector<128x128xbf16>, vector<8x128xf32> -> vector<8x128xf32>
    %84 = arith.addf %78, %83 : vector<8x128xf32>
    %85 = vector.extract_strided_slice %71 {offsets = [16, 0], sizes = [8, 128], strides = [1, 1]} : vector<96x128xf32> to vector<8x128xf32>
    %86 = arith.truncf %85 : vector<8x128xf32> to vector<8x128xbf16>
    %c2_51 = arith.constant 2 : index
    %c0_52 = arith.constant 0 : index
    %c0_53 = arith.constant 0 : index
    %87 = vector.load %arg4[%c2_51, %c0_52, %c0_53] : memref<12x128x128xbf16, #tpu.memory_space<vmem>>, vector<1x128x128xbf16>
    %88 = vector.shape_cast %87 : vector<1x128x128xbf16> to vector<128x128xbf16>
    %cst_54 = arith.constant dense<0.000000e+00> : vector<8x128xf32>
    %89 = tpu.matmul %86, %88, %cst_54 {dimension_numbers = #tpu.dot_dimension_numbers<[1], [0], [0], [1], [0, 0, 1, 1], [], []>} : vector<8x128xbf16>, vector<128x128xbf16>, vector<8x128xf32> -> vector<8x128xf32>
    %90 = arith.addf %84, %89 : vector<8x128xf32>
    %91 = vector.extract_strided_slice %71 {offsets = [24, 0], sizes = [8, 128], strides = [1, 1]} : vector<96x128xf32> to vector<8x128xf32>
    %92 = arith.truncf %91 : vector<8x128xf32> to vector<8x128xbf16>
    %c3_55 = arith.constant 3 : index
    %c0_56 = arith.constant 0 : index
    %c0_57 = arith.constant 0 : index
    %93 = vector.load %arg4[%c3_55, %c0_56, %c0_57] : memref<12x128x128xbf16, #tpu.memory_space<vmem>>, vector<1x128x128xbf16>
    %94 = vector.shape_cast %93 : vector<1x128x128xbf16> to vector<128x128xbf16>
    %cst_58 = arith.constant dense<0.000000e+00> : vector<8x128xf32>
    %95 = tpu.matmul %92, %94, %cst_58 {dimension_numbers = #tpu.dot_dimension_numbers<[1], [0], [0], [1], [0, 0, 1, 1], [], []>} : vector<8x128xbf16>, vector<128x128xbf16>, vector<8x128xf32> -> vector<8x128xf32>
    %96 = arith.addf %90, %95 : vector<8x128xf32>
    %97 = vector.extract_strided_slice %71 {offsets = [32, 0], sizes = [8, 128], strides = [1, 1]} : vector<96x128xf32> to vector<8x128xf32>
    %98 = arith.truncf %97 : vector<8x128xf32> to vector<8x128xbf16>
    %c4_59 = arith.constant 4 : index
    %c0_60 = arith.constant 0 : index
    %c0_61 = arith.constant 0 : index
    %99 = vector.load %arg4[%c4_59, %c0_60, %c0_61] : memref<12x128x128xbf16, #tpu.memory_space<vmem>>, vector<1x128x128xbf16>
    %100 = vector.shape_cast %99 : vector<1x128x128xbf16> to vector<128x128xbf16>
    %cst_62 = arith.constant dense<0.000000e+00> : vector<8x128xf32>
    %101 = tpu.matmul %98, %100, %cst_62 {dimension_numbers = #tpu.dot_dimension_numbers<[1], [0], [0], [1], [0, 0, 1, 1], [], []>} : vector<8x128xbf16>, vector<128x128xbf16>, vector<8x128xf32> -> vector<8x128xf32>
    %102 = arith.addf %96, %101 : vector<8x128xf32>
    %103 = vector.extract_strided_slice %71 {offsets = [40, 0], sizes = [8, 128], strides = [1, 1]} : vector<96x128xf32> to vector<8x128xf32>
    %104 = arith.truncf %103 : vector<8x128xf32> to vector<8x128xbf16>
    %c5_63 = arith.constant 5 : index
    %c0_64 = arith.constant 0 : index
    %c0_65 = arith.constant 0 : index
    %105 = vector.load %arg4[%c5_63, %c0_64, %c0_65] : memref<12x128x128xbf16, #tpu.memory_space<vmem>>, vector<1x128x128xbf16>
    %106 = vector.shape_cast %105 : vector<1x128x128xbf16> to vector<128x128xbf16>
    %cst_66 = arith.constant dense<0.000000e+00> : vector<8x128xf32>
    %107 = tpu.matmul %104, %106, %cst_66 {dimension_numbers = #tpu.dot_dimension_numbers<[1], [0], [0], [1], [0, 0, 1, 1], [], []>} : vector<8x128xbf16>, vector<128x128xbf16>, vector<8x128xf32> -> vector<8x128xf32>
    %108 = arith.addf %102, %107 : vector<8x128xf32>
    %109 = vector.extract_strided_slice %71 {offsets = [48, 0], sizes = [8, 128], strides = [1, 1]} : vector<96x128xf32> to vector<8x128xf32>
    %110 = arith.truncf %109 : vector<8x128xf32> to vector<8x128xbf16>
    %c6_67 = arith.constant 6 : index
    %c0_68 = arith.constant 0 : index
    %c0_69 = arith.constant 0 : index
    %111 = vector.load %arg4[%c6_67, %c0_68, %c0_69] : memref<12x128x128xbf16, #tpu.memory_space<vmem>>, vector<1x128x128xbf16>
    %112 = vector.shape_cast %111 : vector<1x128x128xbf16> to vector<128x128xbf16>
    %cst_70 = arith.constant dense<0.000000e+00> : vector<8x128xf32>
    %113 = tpu.matmul %110, %112, %cst_70 {dimension_numbers = #tpu.dot_dimension_numbers<[1], [0], [0], [1], [0, 0, 1, 1], [], []>} : vector<8x128xbf16>, vector<128x128xbf16>, vector<8x128xf32> -> vector<8x128xf32>
    %114 = arith.addf %108, %113 : vector<8x128xf32>
    %115 = vector.extract_strided_slice %71 {offsets = [56, 0], sizes = [8, 128], strides = [1, 1]} : vector<96x128xf32> to vector<8x128xf32>
    %116 = arith.truncf %115 : vector<8x128xf32> to vector<8x128xbf16>
    %c7_71 = arith.constant 7 : index
    %c0_72 = arith.constant 0 : index
    %c0_73 = arith.constant 0 : index
    %117 = vector.load %arg4[%c7_71, %c0_72, %c0_73] : memref<12x128x128xbf16, #tpu.memory_space<vmem>>, vector<1x128x128xbf16>
    %118 = vector.shape_cast %117 : vector<1x128x128xbf16> to vector<128x128xbf16>
    %cst_74 = arith.constant dense<0.000000e+00> : vector<8x128xf32>
    %119 = tpu.matmul %116, %118, %cst_74 {dimension_numbers = #tpu.dot_dimension_numbers<[1], [0], [0], [1], [0, 0, 1, 1], [], []>} : vector<8x128xbf16>, vector<128x128xbf16>, vector<8x128xf32> -> vector<8x128xf32>
    %120 = arith.addf %114, %119 : vector<8x128xf32>
    %121 = vector.extract_strided_slice %71 {offsets = [64, 0], sizes = [8, 128], strides = [1, 1]} : vector<96x128xf32> to vector<8x128xf32>
    %122 = arith.truncf %121 : vector<8x128xf32> to vector<8x128xbf16>
    %c8_75 = arith.constant 8 : index
    %c0_76 = arith.constant 0 : index
    %c0_77 = arith.constant 0 : index
    %123 = vector.load %arg4[%c8_75, %c0_76, %c0_77] : memref<12x128x128xbf16, #tpu.memory_space<vmem>>, vector<1x128x128xbf16>
    %124 = vector.shape_cast %123 : vector<1x128x128xbf16> to vector<128x128xbf16>
    %cst_78 = arith.constant dense<0.000000e+00> : vector<8x128xf32>
    %125 = tpu.matmul %122, %124, %cst_78 {dimension_numbers = #tpu.dot_dimension_numbers<[1], [0], [0], [1], [0, 0, 1, 1], [], []>} : vector<8x128xbf16>, vector<128x128xbf16>, vector<8x128xf32> -> vector<8x128xf32>
    %126 = arith.addf %120, %125 : vector<8x128xf32>
    %127 = vector.extract_strided_slice %71 {offsets = [72, 0], sizes = [8, 128], strides = [1, 1]} : vector<96x128xf32> to vector<8x128xf32>
    %128 = arith.truncf %127 : vector<8x128xf32> to vector<8x128xbf16>
    %c9_79 = arith.constant 9 : index
    %c0_80 = arith.constant 0 : index
    %c0_81 = arith.constant 0 : index
    %129 = vector.load %arg4[%c9_79, %c0_80, %c0_81] : memref<12x128x128xbf16, #tpu.memory_space<vmem>>, vector<1x128x128xbf16>
    %130 = vector.shape_cast %129 : vector<1x128x128xbf16> to vector<128x128xbf16>
    %cst_82 = arith.constant dense<0.000000e+00> : vector<8x128xf32>
    %131 = tpu.matmul %128, %130, %cst_82 {dimension_numbers = #tpu.dot_dimension_numbers<[1], [0], [0], [1], [0, 0, 1, 1], [], []>} : vector<8x128xbf16>, vector<128x128xbf16>, vector<8x128xf32> -> vector<8x128xf32>
    %132 = arith.addf %126, %131 : vector<8x128xf32>
    %133 = vector.extract_strided_slice %71 {offsets = [80, 0], sizes = [8, 128], strides = [1, 1]} : vector<96x128xf32> to vector<8x128xf32>
    %134 = arith.truncf %133 : vector<8x128xf32> to vector<8x128xbf16>
    %c10_83 = arith.constant 10 : index
    %c0_84 = arith.constant 0 : index
    %c0_85 = arith.constant 0 : index
    %135 = vector.load %arg4[%c10_83, %c0_84, %c0_85] : memref<12x128x128xbf16, #tpu.memory_space<vmem>>, vector<1x128x128xbf16>
    %136 = vector.shape_cast %135 : vector<1x128x128xbf16> to vector<128x128xbf16>
    %cst_86 = arith.constant dense<0.000000e+00> : vector<8x128xf32>
    %137 = tpu.matmul %134, %136, %cst_86 {dimension_numbers = #tpu.dot_dimension_numbers<[1], [0], [0], [1], [0, 0, 1, 1], [], []>} : vector<8x128xbf16>, vector<128x128xbf16>, vector<8x128xf32> -> vector<8x128xf32>
    %138 = arith.addf %132, %137 : vector<8x128xf32>
    %139 = vector.extract_strided_slice %71 {offsets = [88, 0], sizes = [8, 128], strides = [1, 1]} : vector<96x128xf32> to vector<8x128xf32>
    %140 = arith.truncf %139 : vector<8x128xf32> to vector<8x128xbf16>
    %c11_87 = arith.constant 11 : index
    %c0_88 = arith.constant 0 : index
    %c0_89 = arith.constant 0 : index
    %141 = vector.load %arg4[%c11_87, %c0_88, %c0_89] : memref<12x128x128xbf16, #tpu.memory_space<vmem>>, vector<1x128x128xbf16>
    %142 = vector.shape_cast %141 : vector<1x128x128xbf16> to vector<128x128xbf16>
    %cst_90 = arith.constant dense<0.000000e+00> : vector<8x128xf32>
    %143 = tpu.matmul %140, %142, %cst_90 {dimension_numbers = #tpu.dot_dimension_numbers<[1], [0], [0], [1], [0, 0, 1, 1], [], []>} : vector<8x128xbf16>, vector<128x128xbf16>, vector<8x128xf32> -> vector<8x128xf32>
    %144 = arith.addf %138, %143 : vector<8x128xf32>
    %145 = vector.extract_strided_slice %0 {offsets = [5, 0], sizes = [1, 128], strides = [1, 1]} : vector<16x128xf32> to vector<1x128xf32>
    %146 = vector.broadcast %145 : vector<1x128xf32> to vector<8x128xf32>
    %147 = arith.addf %144, %146 : vector<8x128xf32>
    %cst_91 = arith.constant 5.000000e-01 : f32
    %148 = vector.broadcast %cst_91 : f32 to vector<8x128xf32>
    %149 = arith.mulf %148, %147 : vector<8x128xf32>
    %cst_92 = arith.constant 4.471500e-02 : f32
    %150 = vector.broadcast %cst_92 : f32 to vector<8x128xf32>
    %151 = arith.mulf %150, %147 : vector<8x128xf32>
    %152 = arith.mulf %151, %147 : vector<8x128xf32>
    %153 = arith.mulf %152, %147 : vector<8x128xf32>
    %154 = arith.addf %147, %153 : vector<8x128xf32>
    %cst_93 = arith.constant 0.797884583 : f32
    %155 = vector.broadcast %cst_93 : f32 to vector<8x128xf32>
    %156 = arith.mulf %155, %154 : vector<8x128xf32>
    %157 = math.tanh %156 : vector<8x128xf32>
    %cst_94 = arith.constant 1.000000e+00 : f32
    %158 = vector.broadcast %cst_94 : f32 to vector<8x128xf32>
    %159 = arith.addf %158, %157 : vector<8x128xf32>
    %160 = arith.mulf %149, %159 : vector<8x128xf32>
    %cst_95 = arith.constant dense<0.000000e+00> : vector<8xf32>
    %161 = vector.multi_reduction <add>, %160, %cst_95 [1] : vector<8x128xf32> to vector<8xf32>
    %162 = vector.shape_cast %161 : vector<8xf32> to vector<8x1xf32>
    %cst_96 = arith.constant 0.010416667 : f32
    %163 = vector.broadcast %cst_96 : f32 to vector<8x1xf32>
    %164 = arith.mulf %162, %163 : vector<8x1xf32>
    %165 = arith.mulf %160, %160 : vector<8x128xf32>
    %cst_97 = arith.constant dense<0.000000e+00> : vector<8xf32>
    %166 = vector.multi_reduction <add>, %165, %cst_97 [1] : vector<8x128xf32> to vector<8xf32>
    %167 = vector.shape_cast %166 : vector<8xf32> to vector<8x1xf32>
    %cst_98 = arith.constant 0.010416667 : f32
    %168 = vector.broadcast %cst_98 : f32 to vector<8x1xf32>
    %169 = arith.mulf %167, %168 : vector<8x1xf32>
    %170 = arith.mulf %164, %164 : vector<8x1xf32>
    %171 = arith.subf %169, %170 : vector<8x1xf32>
    %172 = vector.broadcast %164 : vector<8x1xf32> to vector<8x128xf32>
    %173 = arith.subf %160, %172 : vector<8x128xf32>
    %cst_99 = arith.constant 9.99999996E-13 : f32
    %174 = vector.broadcast %cst_99 : f32 to vector<8x1xf32>
    %175 = arith.addf %171, %174 : vector<8x1xf32>
    %176 = math.rsqrt %175 : vector<8x1xf32>
    %177 = vector.broadcast %176 : vector<8x1xf32> to vector<8x128xf32>
    %178 = arith.mulf %173, %177 : vector<8x128xf32>
    %179 = vector.extract_strided_slice %0 {offsets = [6, 0], sizes = [1, 128], strides = [1, 1]} : vector<16x128xf32> to vector<1x128xf32>
    %180 = vector.broadcast %179 : vector<1x128xf32> to vector<8x128xf32>
    %181 = arith.mulf %178, %180 : vector<8x128xf32>
    %182 = vector.extract_strided_slice %0 {offsets = [7, 0], sizes = [1, 128], strides = [1, 1]} : vector<16x128xf32> to vector<1x128xf32>
    %183 = vector.broadcast %182 : vector<1x128xf32> to vector<8x128xf32>
    %184 = arith.addf %181, %183 : vector<8x128xf32>
    %185 = arith.truncf %184 : vector<8x128xf32> to vector<8x128xbf16>
    %c3_100 = arith.constant 3 : index
    %c0_101 = arith.constant 0 : index
    %c0_102 = arith.constant 0 : index
    %186 = vector.load %arg3[%c3_100, %c0_101, %c0_102] : memref<4x128x128xbf16, #tpu.memory_space<vmem>>, vector<1x128x128xbf16>
    %187 = vector.shape_cast %186 : vector<1x128x128xbf16> to vector<128x128xbf16>
    %cst_103 = arith.constant dense<0.000000e+00> : vector<8x128xf32>
    %188 = tpu.matmul %185, %187, %cst_103 {dimension_numbers = #tpu.dot_dimension_numbers<[1], [0], [0], [1], [0, 0, 1, 1], [], []>} : vector<8x128xbf16>, vector<128x128xbf16>, vector<8x128xf32> -> vector<8x128xf32>
    %189 = vector.extract_strided_slice %0 {offsets = [8, 0], sizes = [1, 128], strides = [1, 1]} : vector<16x128xf32> to vector<1x128xf32>
    %190 = vector.broadcast %189 : vector<1x128xf32> to vector<8x128xf32>
    %191 = arith.addf %188, %190 : vector<8x128xf32>
    %c0_104 = arith.constant 0 : index
    %c0_105 = arith.constant 0 : index
    %192 = vector.load %arg6[%c0_104, %c0_105] : memref<8x128xf32, #tpu.memory_space<vmem>>, vector<8x128xf32>
    tpu.vector_store %arg6[%c0_104, %c0_105], %191 {strides = array<i32>} : memref<8x128xf32, #tpu.memory_space<vmem>>, vector<8x128xf32>,
    return
  }
  func.func @transform_0(%arg0: i32) -> (i32, i32) {
    %c0_i32 = arith.constant 0 : i32
    %c0_i32_0 = arith.constant 0 : i32
    return %arg0, %c0_i32 : i32, i32
  }
  func.func @transform_1(%arg0: i32) -> (i32, i32, i32) {
    %c0_i32 = arith.constant 0 : i32
    %c0_i32_0 = arith.constant 0 : i32
    %c0_i32_1 = arith.constant 0 : i32
    return %c0_i32, %arg0, %c0_i32_0 : i32, i32, i32
  }
  func.func @transform_2(%arg0: i32) -> (i32, i32, i32) {
    %c0_i32 = arith.constant 0 : i32
    %c0_i32_0 = arith.constant 0 : i32
    %c0_i32_1 = arith.constant 0 : i32
    %c0_i32_2 = arith.constant 0 : i32
    return %c0_i32, %c0_i32_0, %c0_i32_1 : i32, i32, i32
  }
  func.func @transform_3(%arg0: i32) -> (i32, i32, i32) {
    %c0_i32 = arith.constant 0 : i32
    %c0_i32_0 = arith.constant 0 : i32
    %c0_i32_1 = arith.constant 0 : i32
    %c0_i32_2 = arith.constant 0 : i32
    return %c0_i32, %c0_i32_0, %c0_i32_1 : i32, i32, i32
  }
  func.func @transform_4(%arg0: i32) -> (i32, i32) {
    %c0_i32 = arith.constant 0 : i32
    %c0_i32_0 = arith.constant 0 : i32
    %c0_i32_1 = arith.constant 0 : i32
    return %c0_i32, %c0_i32_0 : i32, i32
  }
  func.func @transform_5(%arg0: i32) -> (i32, i32) {
    %c0_i32 = arith.constant 0 : i32
    %c0_i32_0 = arith.constant 0 : i32
    return %arg0, %c0_i32 : i32, i32
  }
}

</mosaic_0001>

<bundles_post_ra>
// kernel: tile.19
= control target key start
LH: loop header
LB: loop body
LE: loop exit
PB: predicated region body
PF: predicated region fallthrough
CT: control target
= control target key end

     0   :  { %vm100_vm0 = vcmask 1047556   ;;  %s348_s15 = smov 64   ;;  %vm102_vm1 = vcmask 261120   ;;  %vm148_vm2 = vcmask 785920   ;;  %vm198_vm3 = vcmask 523520   ;;  %s513_s0 = inlined_call_operand.vmem [shape: f32[12,2,3,32], index: 0, kind: input, shape index: {}]   ;;  %s514_s1 = inlined_call_operand.vmem [shape: f32[12,2,96], index: 1, kind: output, shape index: {}]  }
   0x1   :  { %v328_v0 = vld [vmem:[%s513_s0 + $0x1c] sm:$0xf]  ;;  %v329_v1 = vld [vmem:[%s513_s0 + $0x18] sm:$0xf]  ;;  %v330_v2 = vld [vmem:[%s513_s0 + $0x14] sm:$0xf] }
   0x2   :  { %71 = vst [vmem:[#allocation1 + $0x38] sm:$0xf] %v328_v0  ;;  %v331_v3 = vld [vmem:[%s513_s0 + $0x10] sm:$0xf]  ;;  %v332_v4 = vld [vmem:[%s513_s0 + $0xc] sm:$0xf] }
   0x3   :  { %75 = vst [vmem:[#allocation1 + $0x30] sm:$0xf] %v329_v1  ;;  %v333_v5 = vld [vmem:[%s513_s0 + $0x8] sm:$0xf]  ;;  %v334_v6 = vld [vmem:[%s513_s0 + $0x4] sm:$0xf] }
   0x4   :  { %79 = vst [vmem:[#allocation1 + $0x28] sm:$0xf] %v330_v2  ;;  %v96_v7 = vld [vmem:[%s513_s0] sm:$0xf]  ;;  %v312_v8 = vld [vmem:[%s513_s0 + $0x5c] sm:$0xf] }
   0x5   :  { %83 = vst [vmem:[#allocation1 + $0x20] sm:$0xf] %v331_v3  ;;  %v313_v9 = vld [vmem:[%s513_s0 + $0x58] sm:$0xf]  ;;  %v314_v10 = vld [vmem:[%s513_s0 + $0x54] sm:$0xf] }
   0x6   :  { %87 = vst [vmem:[#allocation1 + $0x18] sm:$0xf] %v332_v4  ;;  %v315_v11 = vld [vmem:[%s513_s0 + $0x50] sm:$0xf]  ;;  %v316_v12 = vld [vmem:[%s513_s0 + $0x4c] sm:$0xf] }
   0x7   :  { %91 = vst [vmem:[#allocation1 + $0x10] sm:$0xf] %v333_v5  ;;  %v317_v13 = vld [vmem:[%s513_s0 + $0x48] sm:$0xf]  ;;  %v318_v14 = vld [vmem:[%s513_s0 + $0x44] sm:$0xf] }
   0x8   :  { %95 = vst [vmem:[#allocation1 + $0x8] sm:$0xf] %v334_v6  ;;  %v319_v15 = vld [vmem:[%s513_s0 + $0x40] sm:$0xf]  ;;  %v320_v17 = vld [vmem:[%s513_s0 + $0x3c] sm:$0xf] }
   0x9   :  { %97 = vst [vmem:[#allocation1] sm:$0xf] %v96_v7  ;;  %v321_v18 = vld [vmem:[%s513_s0 + $0x38] sm:$0xf]  ;;  %v322_v21 = vld [vmem:[%s513_s0 + $0x34] sm:$0xf] }
   0xa   :  { %7 = vst [vmem:[#allocation1 + $0xb8] sm:$0xf] %v312_v8  ;;  %v323_v22 = vld [vmem:[%s513_s0 + $0x30] sm:$0xf]  ;;  %v324_v23 = vld [vmem:[%s513_s0 + $0x2c] sm:$0xf] }
   0xb   :  { %11 = vst [vmem:[#allocation1 + $0xb0] sm:$0xf] %v313_v9  ;;  %v325_v24 = vld [vmem:[%s513_s0 + $0x28] sm:$0xf]  ;;  %v326_v25 = vld [vmem:[%s513_s0 + $0x24] sm:$0xf] }
   0xc   :  { %15 = vst [vmem:[#allocation1 + $0xa8] sm:$0xf] %v314_v10  ;;  %v143_v16 = vld [vmem:[#allocation1 + $0x2] ss:$8 sm:$0xf0]  }
   0xd   :  { %19 = vst [vmem:[#allocation1 + $0xa0] sm:$0xf] %v315_v11  ;;  %v327_v26 = vld [vmem:[%s513_s0 + $0x20] sm:$0xf]  ;;  %s349_s0 = smov 32  }
   0xe   :  { %23 = vst [vmem:[#allocation1 + $0x98] sm:$0xf] %v316_v12  ;;  %v193_v31 = vld [vmem:[#allocation1 + $0x1] ss:$8 sm:$0xf0]  }
   0xf   :  { %27 = vst [vmem:[#allocation1 + $0x90] sm:$0xf] %v317_v13  ;;  %v99_v43 = vld [vmem:[#allocation1] ss:$8 sm:$0xf0]  }
  0x10   :  { %v141_v19 = vld [vmem:[#allocation1 + $0x2] ss:$8 sm:$0xf]   ;;  %31 = vst [vmem:[#allocation1 + $0x88] sm:$0xf] %v318_v14 }
  0x11   :  { %v145_v20 = vsel %vm100_vm0, %v143_v16, %v141_v19  ;;  %35 = vst [vmem:[#allocation1 + $0x80] sm:$0xf] %v319_v15  ;;  %v191_v30 = vld [vmem:[#allocation1 + $0x1] ss:$8 sm:$0xf]  }
  0x12   :  { %146 = vrot.lane.b32.xlu0 %v145_v20, %s348_s15  ;;  %39 = vst [vmem:[#allocation1 + $0x78] sm:$0xf] %v320_v17  ;;  %v195_v34 = vsel %vm100_vm0, %v193_v31, %v191_v30  ;;  %v98_v42 = vld [vmem:[#allocation1] ss:$8 sm:$0xf]  }
  0x13   :  { %43 = vst [vmem:[#allocation1 + $0x70] sm:$0xf] %v321_v18  ;;  %v101_v44 = vsel %vm100_vm0, %v99_v43, %v98_v42 }
  0x14   :  { %47 = vst [vmem:[#allocation1 + $0x68] sm:$0xf] %v322_v21  ;;  %v176_v27 = vld [vmem:[#allocation1 + $0x82] ss:$8 sm:$0xf0]  }
  0x15   :  { %51 = vst [vmem:[#allocation1 + $0x60] sm:$0xf] %v323_v22  ;;  %v226_v40 = vld [vmem:[#allocation1 + $0x81] ss:$8 sm:$0xf0]  }
  0x16   :  { %55 = vst [vmem:[#allocation1 + $0x58] sm:$0xf] %v324_v23  ;;  %v128_v46 = vld [vmem:[#allocation1 + $0x80] ss:$8 sm:$0xf0]  }
  0x17   :  { %59 = vst [vmem:[#allocation1 + $0x50] sm:$0xf] %v325_v24 }
  0x18   :  { %v174_v28 = vld [vmem:[#allocation1 + $0x82] ss:$8 sm:$0xf]   ;;  %63 = vst [vmem:[#allocation1 + $0x48] sm:$0xf] %v326_v25 }
  0x19   :  { %v178_v29 = vsel %vm100_vm0, %v176_v27, %v174_v28  ;;  %67 = vst [vmem:[#allocation1 + $0x40] sm:$0xf] %v327_v26  ;;  %v224_v39 = vld [vmem:[#allocation1 + $0x81] ss:$8 sm:$0xf]  }
  0x1a   :  { %179 = vrot.lane.b32.xlu1 %v178_v29, %s348_s15  ;;  %v228_v41 = vsel %vm100_vm0, %v226_v40, %v224_v39  ;;  %103 = vst.msk [vmem:[#allocation0] sm:$0x3] %vm102_vm1, %v101_v44   ;;  %v126_v45 = vld [vmem:[#allocation1 + $0x80] ss:$8 sm:$0xf]  }
  0x1b   :  { %105 = vst.msk [vmem:[#allocation0 + $0x6] sm:$0xc] %vm102_vm1, %v101_v44   ;;  %v130_v47 = vsel %vm100_vm0, %v128_v46, %v126_v45 }
  0x1c   :  { %v159_v32 = vld [vmem:[#allocation1 + $0x42] ss:$8 sm:$0xf0]   ;;  %v209_v33 = vld [vmem:[#allocation1 + $0x41] ss:$8 sm:$0xf0]  }
  0x1d   :  { %107 = vst.msk [vmem:[#allocation0 + $0xc] sm:$0x30] %vm102_vm1, %v101_v44   ;;  %v113_v49 = vld [vmem:[#allocation1 + $0x40] ss:$8 sm:$0xf0]  }
  0x1e   :  { %109 = vst.msk [vmem:[#allocation0 + $0x12] sm:$0xc0] %vm102_vm1, %v101_v44  }
  0x1f   :  { %133 = vst.msk [vmem:[#allocation0 + $0x40] sm:$0x3] %vm102_vm1, %v130_v47  }
  0x20   :  { %v157_v35 = vld [vmem:[#allocation1 + $0x42] ss:$8 sm:$0xf]   ;;  %v207_v36 = vld [vmem:[#allocation1 + $0x41] ss:$8 sm:$0xf]  }
  0x21   :  { %v161_v37 = vsel %vm100_vm0, %v159_v32, %v157_v35  ;;  %v211_v38 = vsel %vm100_vm0, %v209_v33, %v207_v36  ;;  %135 = vst.msk [vmem:[#allocation0 + $0x46] sm:$0xc] %vm102_vm1, %v130_v47   ;;  %v111_v48 = vld [vmem:[#allocation1 + $0x40] ss:$8 sm:$0xf]  }
  0x22   :  { %162 = vrot.lane.b32.xlu0 %v161_v37, %s348_s15  ;;  %196 = vrot.lane.b32.xlu1 %v195_v34, %s349_s0  ;;  %137 = vst.msk [vmem:[#allocation0 + $0x4c] sm:$0x30] %vm102_vm1, %v130_v47   ;;  %v115_v50 = vsel %vm100_vm0, %v113_v49, %v111_v48 }
  0x23   :  { %212 = vrot.lane.b32.xlu2 %v211_v38, %s349_s0  ;;  %139 = vst.msk [vmem:[#allocation0 + $0x52] sm:$0xc0] %vm102_vm1, %v130_v47  }
  0x24   :  { %118 = vst.msk [vmem:[#allocation0 + $0x20] sm:$0x3] %vm102_vm1, %v115_v50  }
  0x25   :  { %120 = vst.msk [vmem:[#allocation0 + $0x26] sm:$0xc] %vm102_vm1, %v115_v50  }
  0x26   :  { %122 = vst.msk [vmem:[#allocation0 + $0x2c] sm:$0x30] %vm102_vm1, %v115_v50  }
  0x27   :  { %124 = vst.msk [vmem:[#allocation0 + $0x32] sm:$0xc0] %vm102_vm1, %v115_v50  }
  0x2b   :  { %229 = vrot.lane.b32.xlu2 %v228_v41, %s349_s0 }
  0x7d   :  { %v213_v51 = vpop.permute.xlu2 %212  }
  0x84   :  { %v147_v52 = vpop.permute.xlu0 %146  }
  0x85   :  { %149 = vst.msk [vmem:[#allocation0] sm:$0x3] %vm148_vm2, %v147_v52   ;;  %v230_v53 = vpop.permute.xlu2 %229  }
  0x86   :  { %151 = vst.msk [vmem:[#allocation0 + $0x6] sm:$0xc] %vm148_vm2, %v147_v52  }
  0x87   :  { %153 = vst.msk [vmem:[#allocation0 + $0xc] sm:$0x30] %vm148_vm2, %v147_v52  }
  0x88   :  { %155 = vst.msk [vmem:[#allocation0 + $0x12] sm:$0xc0] %vm148_vm2, %v147_v52  }
  0x8c   :  { %v180_v54 = vpop.permute.xlu1 %179  }
  0x8d   :  { %183 = vst.msk [vmem:[#allocation0 + $0x40] sm:$0x3] %vm148_vm2, %v180_v54  }
  0x8e   :  { %185 = vst.msk [vmem:[#allocation0 + $0x46] sm:$0xc] %vm148_vm2, %v180_v54  }
  0x8f   :  { %187 = vst.msk [vmem:[#allocation0 + $0x4c] sm:$0x30] %vm148_vm2, %v180_v54  }
  0x90   :  { %189 = vst.msk [vmem:[#allocation0 + $0x52] sm:$0xc0] %vm148_vm2, %v180_v54  }
  0x91   :  { %233 = vst.msk [vmem:[#allocation0 + $0x40] sm:$0x3] %vm198_vm3, %v230_v53  }
  0x92   :  { %235 = vst.msk [vmem:[#allocation0 + $0x46] sm:$0xc] %vm198_vm3, %v230_v53  }
  0x93   :  { %237 = vst.msk [vmem:[#allocation0 + $0x4c] sm:$0x30] %vm198_vm3, %v230_v53  }
  0x94   :  { %v163_v55 = vpop.permute.xlu0 %162   ;;  %239 = vst.msk [vmem:[#allocation0 + $0x52] sm:$0xc0] %vm198_vm3, %v230_v53   ;;  %v197_v56 = vpop.permute.xlu1 %196  }
  0x95   :  { %166 = vst.msk [vmem:[#allocation0 + $0x20] sm:$0x3] %vm148_vm2, %v163_v55  }
  0x96   :  { %168 = vst.msk [vmem:[#allocation0 + $0x26] sm:$0xc] %vm148_vm2, %v163_v55  }
  0x97   :  { %170 = vst.msk [vmem:[#allocation0 + $0x2c] sm:$0x30] %vm148_vm2, %v163_v55  }
  0x98   :  { %172 = vst.msk [vmem:[#allocation0 + $0x32] sm:$0xc0] %vm148_vm2, %v163_v55   ;;  %v289_v57 = vld [vmem:[#allocation0 + $0x40] sm:$0x3] }
  0x99   :  { %342 = vst [vmem:[%s514_s1 + $0x10] sm:$0x3] %v289_v57  ;;  %v295_v58 = vld [vmem:[#allocation0 + $0x48] sm:$0x3] }
  0x9a   :  { %343 = vst [vmem:[%s514_s1 + $0x12] sm:$0x3] %v295_v58  ;;  %v301_v59 = vld [vmem:[#allocation0 + $0x50] sm:$0x3] }
  0x9b   :  { %344 = vst [vmem:[%s514_s1 + $0x14] sm:$0x3] %v301_v59  ;;  %v307_v60 = vld [vmem:[#allocation0 + $0x58] sm:$0x3] }
  0x9c   :  { %345 = vst [vmem:[%s514_s1 + $0x16] sm:$0x3] %v307_v60 }
  0x9d   :  { %216 = vst.msk [vmem:[#allocation0 + $0x20] sm:$0x3] %vm198_vm3, %v213_v51  }
  0x9e   :  { %218 = vst.msk [vmem:[#allocation0 + $0x26] sm:$0xc] %vm198_vm3, %v213_v51  }
  0x9f   :  { %220 = vst.msk [vmem:[#allocation0 + $0x2c] sm:$0x30] %vm198_vm3, %v213_v51  }
  0xa0   :  { %222 = vst.msk [vmem:[#allocation0 + $0x32] sm:$0xc0] %vm198_vm3, %v213_v51  }
  0xa1   :  { %199 = vst.msk [vmem:[#allocation0] sm:$0x3] %vm198_vm3, %v197_v56  }
  0xa2   :  { %201 = vst.msk [vmem:[#allocation0 + $0x6] sm:$0xc] %vm198_vm3, %v197_v56  }
  0xa3   :  { %203 = vst.msk [vmem:[#allocation0 + $0xc] sm:$0x30] %vm198_vm3, %v197_v56  }
  0xa4   :  { %205 = vst.msk [vmem:[#allocation0 + $0x12] sm:$0xc0] %vm198_vm3, %v197_v56   ;;  %v265_v61 = vld [vmem:[#allocation0 + $0x20] sm:$0x3] }
  0xa5   :  { %338 = vst [vmem:[%s514_s1 + $0x8] sm:$0x3] %v265_v61  ;;  %v271_v62 = vld [vmem:[#allocation0 + $0x28] sm:$0x3] }
  0xa6   :  { %339 = vst [vmem:[%s514_s1 + $0xa] sm:$0x3] %v271_v62  ;;  %v277_v63 = vld [vmem:[#allocation0 + $0x30] sm:$0x3] }
  0xa7   :  { %340 = vst [vmem:[%s514_s1 + $0xc] sm:$0x3] %v277_v63  ;;  %v283_v0 = vld [vmem:[#allocation0 + $0x38] sm:$0x3] }
  0xa8   :  { %v242_v1 = vld [vmem:[#allocation0] sm:$0x3]  ;;  %341 = vst [vmem:[%s514_s1 + $0xe] sm:$0x3] %v283_v0 }
  0xa9   :  { %245 = vst [vmem:[%s514_s1] sm:$0x3] %v242_v1  ;;  %v247_v2 = vld [vmem:[#allocation0 + $0x8] sm:$0x3] }
  0xaa   :  { %335 = vst [vmem:[%s514_s1 + $0x2] sm:$0x3] %v247_v2  ;;  %v253_v3 = vld [vmem:[#allocation0 + $0x10] sm:$0x3] }
  0xab   :  { %336 = vst [vmem:[%s514_s1 + $0x4] sm:$0x3] %v253_v3  ;;  %v259_v4 = vld [vmem:[#allocation0 + $0x18] sm:$0x3] }
  0xac   :  { %337 = vst [vmem:[%s514_s1 + $0x6] sm:$0x3] %v259_v4 }

// kernel: tile.14
= control target key start
LH: loop header
LB: loop body
LE: loop exit
PB: predicated region body
PF: predicated region fallthrough
CT: control target
= control target key end

     0   :  { %s29_s10 = smov 3  ;;  %s45_s11 = smov 72   ;;  %vm12_vm0 = vcmask 195584   ;;  %vm19_vm1 = vcmask 785984   ;;  %vm26_vm2 = vcmask 589184   ;;  %vm33_vm3 = vcmask 392384   ;;  %s67_s0 = inlined_call_operand.vmem [shape: f32[2,4,24], index: 0, kind: input, shape index: {}]   ;;  %s68_s1 = inlined_call_operand.vmem [shape: f32[2,96], index: 1, kind: output, shape index: {}]  }
   0x1   :  { %v41_v0 = vld [vmem:[%s67_s0 + $0x4] sm:$0xf]  ;;  %v8_v1 = vld [vmem:[%s67_s0] sm:$0xf]  ;;  %s15_s0 = smov 3  ;;  %s46_s12 = smov 24  }
   0x2   :  { %7 = vst [vmem:[#allocation1 + $0x8] sm:$0xf] %v41_v0  ;;  %s22_s13 = smov 3  ;;  %s47_s14 = smov 48  }
   0x3   :  { %9 = vst [vmem:[#allocation1] sm:$0xf] %v8_v1  ;;  %s10_s15 = smov 3 }
   0xa   :  { %v16_v2 = vld [vmem:[#allocation1 + $0x3] ss:$8 sm:%s15_s0]   ;;  %v30_v3 = vld [vmem:[#allocation1 + $0x1] ss:$8 sm:%s29_s10]   ;;  %v23_v4 = vld [vmem:[#allocation1 + $0x2] ss:$8 sm:%s22_s13]  }
   0xb   :  { %17 = vrot.lane.b32.xlu0 %v16_v2, %s45_s11  ;;  %31 = vrot.lane.b32.xlu1 %v30_v3, %s46_s12  ;;  %v11_v5 = vld [vmem:[#allocation1] ss:$8 sm:%s10_s15]  }
   0xc   :  { %13 = vst.msk [vmem:[#allocation0] sm:$0x3] %vm12_vm0, %v11_v5  }
  0x13   :  { %24 = vrot.lane.b32.xlu0 %v23_v4, %s47_s14 }
  0x7d   :  { %v18_v6 = vpop.permute.xlu0 %17   ;;  %v32_v7 = vpop.permute.xlu1 %31  }
  0x7e   :  { %20 = vst.msk [vmem:[#allocation0] sm:$0x3] %vm19_vm1, %v18_v6  }
  0x85   :  { %v25_v8 = vpop.permute.xlu0 %24  }
  0x86   :  { %27 = vst.msk [vmem:[#allocation0] sm:$0x3] %vm26_vm2, %v25_v8  }
  0x87   :  { %34 = vst.msk [vmem:[#allocation0] sm:$0x3] %vm33_vm3, %v32_v7  }
  0x8e   :  { %v37_v9 = vld [vmem:[#allocation0] sm:$0x3] }
  0x8f   :  { %40 = vst [vmem:[%s68_s1] sm:$0x3] %v37_v9 }

// kernel: chartfc_forward.1
= control target key start
LH: loop header
LB: loop body
LE: loop exit
PB: predicated region body
PF: predicated region fallthrough
CT: control target
= control target key end

     0   :  { %s2912_s2 = inlined_call_operand.vmem [shape: bf16[4,128,128], index: 2, kind: input, shape index: {}]   ;;  %s2913_s4 = inlined_call_operand.vmem [shape: f32[16,128], index: 4, kind: input, shape index: {}]   ;;  %s2914_s0 = inlined_call_operand.vmem [shape: f32[8,128], index: 0, kind: input, shape index: {}]   ;;  %s2915_s1 = inlined_call_operand.vmem [shape: f32[12,8,128], index: 1, kind: input, shape index: {}]   ;;  %s2916_s3 = inlined_call_operand.vmem [shape: bf16[12,128,128], index: 3, kind: input, shape index: {}]   ;;  %s2917_s5 = inlined_call_operand.vmem [shape: f32[8,128], index: 5, kind: output, shape index: {}]  }
   0x1   :  { %v2285_v0 = vld [vmem:[%s2912_s2 + $0x38] sm:$0xff]  ;;  %v2284_v1 = vld [vmem:[%s2912_s2 + $0x30] sm:$0xff]  ;;  %v2283_v2 = vld [vmem:[%s2912_s2 + $0x28] sm:$0xff] }
   0x2   :  { %155 = vmatpush.bf16.msra.mxu0 %v2285_v0  ;;  %v2282_v3 = vld [vmem:[%s2912_s2 + $0x20] sm:$0xff]  ;;  %v2281_v4 = vld [vmem:[%s2912_s2 + $0x18] sm:$0xff]  ;;  %v1531_v8 = vld [vmem:[%s2915_s1 + $0x8] sm:$0xff] }
   0x3   :  { %v2459_v5 = vld [vmem:[%s2913_s4] sm:$0xff]  ;;  %v2280_v12 = vld [vmem:[%s2912_s2 + $0x10] sm:$0xff]  ;;  %v2279_v16 = vld [vmem:[%s2912_s2 + $0x8] sm:$0xff] }
   0x4   :  { %v22_v6 = vld [vmem:[%s2914_s0] sm:$0xff]  ;;  %v58_v11 = vperm.slane %v2459_v5, 0  ;;  %v71_v15 = vperm.slane %v2459_v5, 1  ;;  %v1532_v21 = vld [vmem:[%s2915_s1 + $0x10] sm:$0xff]  ;;  %v1533_v22 = vld [vmem:[%s2915_s1 + $0x18] sm:$0xff] }
   0x5   :  { %v23_v7 = vld [vmem:[%s2915_s1] sm:$0xff]  ;;  %v27_v10 = vmul.f32 %v1531_v8, %v22_v6  ;;  %v30_v23 = vmul.f32 %v1532_v21, %v22_v6  ;;  %v33_v24 = vmul.f32 %v1533_v22, %v22_v6  ;;  %v1535_v31 = vld [vmem:[%s2915_s1 + $0x28] sm:$0xff]  ;;  %v1536_v48 = vld [vmem:[%s2915_s1 + $0x30] sm:$0xff] }
   0x6   :  { %156 = vmatpush.bf16.msra.mxu0 %v2284_v1  ;;  %v24_v9 = vmul.f32 %v23_v7, %v22_v6  ;;  %v2278_v19 = vld [vmem:[%s2912_s2] sm:$0xff]  ;;  %v39_v33 = vmul.f32 %v1535_v31, %v22_v6  ;;  %v1539_v35 = vld [vmem:[%s2915_s1 + $0x48] sm:$0xff]  ;;  %v1537_v49 = vld [vmem:[%s2915_s1 + $0x38] sm:$0xff]  ;;  %v42_v50 = vmul.f32 %v1536_v48, %v22_v6 }
   0x7   :  { %v60_v14 = vmul.f32 %v58_v11, %v27_v10  ;;  %v61_v25 = vmul.f32 %v58_v11, %v30_v23  ;;  %v62_v26 = vmul.f32 %v58_v11, %v33_v24  ;;  %v1534_v30 = vld [vmem:[%s2915_s1 + $0x20] sm:$0xff]  ;;  %v51_v37 = vmul.f32 %v1539_v35, %v22_v6  ;;  %v1540_v52 = vld [vmem:[%s2915_s1 + $0x50] sm:$0xff]  ;;  %v1541_v53 = vld [vmem:[%s2915_s1 + $0x58] sm:$0xff] }
   0x8   :  { %v59_v13 = vmul.f32 %v58_v11, %v24_v9  ;;  %v36_v32 = vmul.f32 %v1534_v30, %v22_v6  ;;  %v1538_v34 = vld [vmem:[%s2915_s1 + $0x40] sm:$0xff]  ;;  %v64_v41 = vmul.f32 %v58_v11, %v39_v33  ;;  %v45_v51 = vmul.f32 %v1537_v49, %v22_v6  ;;  %v2289_v7 = vld [vmem:[%s2912_s2 + $0x58] sm:$0xff]  ;;  %v2288_v8 = vld [vmem:[%s2912_s2 + $0x50] sm:$0xff] }
   0x9   :  { %v73_v18 = vadd.f32 %v71_v15, %v60_v14  ;;  %v74_v27 = vadd.f32 %v71_v15, %v61_v25  ;;  %v75_v28 = vadd.f32 %v71_v15, %v62_v26  ;;  %v48_v36 = vmul.f32 %v1538_v34, %v22_v6  ;;  %v2287_v9 = vld [vmem:[%s2912_s2 + $0x48] sm:$0xff]  ;;  %v2286_v10 = vld [vmem:[%s2912_s2 + $0x40] sm:$0xff] }
   0xa   :  { %157 = vmatpush.bf16.msra.mxu0 %v2283_v2  ;;  %v72_v17 = vadd.f32 %v71_v15, %v59_v13  ;;  %v68_v39 = vmul.f32 %v58_v11, %v51_v37  ;;  %v63_v40 = vmul.f32 %v58_v11, %v36_v32  ;;  %v77_v46 = vadd.f32 %v71_v15, %v64_v41  ;;  %v2293_v2 = vld [vmem:[%s2912_s2 + $0x78] sm:$0xff]  ;;  %v2298_v48 = vld [vmem:[%s2912_s2 + $0xa0] sm:$0xff] }
   0xb   :  { %v85_v29 = vpack.c.bf16 %v75_v28, %v74_v27  ;;  %v67_v38 = vmul.f32 %v58_v11, %v48_v36  ;;  %v54_v54 = vmul.f32 %v1540_v52, %v22_v6  ;;  %v57_v55 = vmul.f32 %v1541_v53, %v22_v6  ;;  %278 = vmatpush.bf16.msra.mxu1 %v2293_v2  ;;  %v2290_v6 = vld [vmem:[%s2912_s2 + $0x60] sm:$0xff] }
   0xc   :  { %v84_v20 = vpack.c.bf16 %v73_v18, %v72_v17  ;;  %v81_v43 = vadd.f32 %v71_v15, %v68_v39  ;;  %v76_v45 = vadd.f32 %v71_v15, %v63_v40  ;;  %v65_v58 = vmul.f32 %v58_v11, %v42_v50  ;;  %v2301_v40 = vld [vmem:[%s2912_s2 + $0xb8] sm:$0xff] }
   0xd   :  { %v80_v42 = vadd.f32 %v71_v15, %v67_v38  ;;  %v69_v56 = vmul.f32 %v58_v11, %v54_v54  ;;  %v70_v57 = vmul.f32 %v58_v11, %v57_v55  ;;  %v66_v59 = vmul.f32 %v58_v11, %v45_v51  ;;  %401 = vmatpush.bf16.msra.mxu2 %v2301_v40  ;;  %v2314_v40 = vld [vmem:[%s2916_s3 + $0x60] sm:$0xff] }
   0xe   :  { %158 = vmatpush.bf16.msra.mxu0 %v2282_v3  ;;  %v86_v47 = vpack.c.bf16 %v77_v46, %v76_v45  ;;  %v78_v63 = vadd.f32 %v71_v15, %v65_v58  ;;  %v2292_v3 = vld [vmem:[%s2912_s2 + $0x70] sm:$0xff]  ;;  %v2297_v58 = vld [vmem:[%s2912_s2 + $0x98] sm:$0xff] }
   0xf   :  { %v88_v44 = vpack.c.bf16 %v81_v43, %v80_v42  ;;  %v82_v60 = vadd.f32 %v71_v15, %v69_v56  ;;  %v83_v61 = vadd.f32 %v71_v15, %v70_v57  ;;  %v79_v0 = vadd.f32 %v71_v15, %v66_v59  ;;  %279 = vmatpush.bf16.msra.mxu1 %v2292_v3  ;;  %v2300_v42 = vld [vmem:[%s2912_s2 + $0xb0] sm:$0xff] }
  0x10   :  { %v2296_v59 = vld [vmem:[%s2912_s2 + $0x90] sm:$0xff] }
  0x11   :  { %v89_v62 = vpack.c.bf16 %v83_v61, %v82_v60  ;;  %v87_v1 = vpack.c.bf16 %v79_v0, %v78_v63  ;;  %402 = vmatpush.bf16.msra.mxu2 %v2300_v42  ;;  %v2295_v60 = vld [vmem:[%s2912_s2 + $0x88] sm:$0xff]  ;;  %v2294_v61 = vld [vmem:[%s2912_s2 + $0x80] sm:$0xff]  ;;  %v2561_v63 = vperm.slane %v2459_v5, 3 }
  0x12   :  { %159 = vmatpush.bf16.msra.mxu0 %v2281_v4  ;;  %v2291_v4 = vld [vmem:[%s2912_s2 + $0x68] sm:$0xff] }
  0x13   :  { %280 = vmatpush.bf16.msra.mxu1 %v2291_v4 }
  0x16   :  { %160 = vmatpush.bf16.msra.mxu0 %v2280_v12  ;;  %v106_v12 = vperm.slane %v2459_v5, 2 }
  0x17   :  { %281 = vmatpush.bf16.msra.mxu1 %v2290_v6 }
  0x1a   :  { %161 = vmatpush.bf16.msra.mxu0 %v2279_v16 }
  0x1b   :  { %282 = vmatpush.bf16.msra.mxu1 %v2289_v7 }
  0x1e   :  { %162 = vmatpush.bf16.msra.mxu0 %v2278_v19 }
  0x1f   :  { %283 = vmatpush.bf16.msra.mxu1 %v2288_v8 }
  0x21   :  { %163 = vmatmul.bf16.vlgmr.msra.gmra.mxu0 %v84_v20 }
  0x23   :  { %284 = vmatpush.bf16.msra.mxu1 %v2287_v9 }
  0x27   :  { %285 = vmatpush.bf16.msra.mxu1 %v2286_v10 }
  0x31   :  { %168 = vmatmul.bf16.gmra.mxu0 %v85_v29 }
  0x41   :  { %173 = vmatmul.bf16.gmra.mxu0 %v86_v47 }
  0x51   :  { %178 = vmatmul.bf16.gmra.mxu0 %v87_v1 }
  0x61   :  { %183 = vmatmul.bf16.gmra.mxu0 %v88_v44  ;;  %v2299_v44 = vld [vmem:[%s2912_s2 + $0xa8] sm:$0xff] }
  0x62   :  { %403 = vmatpush.bf16.msra.mxu2 %v2299_v44 }
  0x66   :  { %404 = vmatpush.bf16.msra.mxu2 %v2298_v48 }
  0x6a   :  { %405 = vmatpush.bf16.msra.mxu2 %v2297_v58  ;;  %v2305_v58 = vld [vmem:[%s2916_s3 + $0x18] sm:$0xff] }
  0x6e   :  { %406 = vmatpush.bf16.msra.mxu2 %v2296_v59  ;;  %v2304_v59 = vld [vmem:[%s2916_s3 + $0x10] sm:$0xff] }
  0x71   :  { %188 = vmatmul.bf16.gmra.mxu0 %v89_v62 }
  0x72   :  { %407 = vmatpush.bf16.msra.mxu2 %v2295_v60  ;;  %v2348_v60 = vld [vmem:[%s2916_s3 + $0x170] sm:$0xff] }
  0x76   :  { %408 = vmatpush.bf16.msra.mxu2 %v2294_v61  ;;  %v2340_v61 = vld [vmem:[%s2916_s3 + $0x130] sm:$0xff] }
  0x9e   :  { %v164_v11 = vpop.f32.mrf.mxu0 }
  0x9f   :  { %v165_v13 = vadd.f32 %v164_v11, %v106_v12 }
  0xa1   :  { %v194_v16 = vmax.f32 %v165_v13, 0.0 }
  0xa6   :  { %v166_v14 = vpop.f32.mrf.mxu0 }
  0xa7   :  { %v167_v15 = vadd.f32 %v166_v14, %v106_v12 }
  0xa9   :  { %v195_v17 = vmax.f32 %v167_v15, 0.0 }
  0xab   :  { %v206_v18 = vpack.c.bf16 %v195_v17, %v194_v16 }
  0xad   :  { %286 = vmatmul.bf16.vlgmr.msra.gmra.mxu1 %v206_v18 }
  0xae   :  { %v169_v19 = vpop.f32.mrf.mxu0 }
  0xaf   :  { %v170_v20 = vadd.f32 %v169_v19, %v106_v12 }
  0xb1   :  { %v196_v22 = vmax.f32 %v170_v20, 0.0 }
  0xb6   :  { %v171_v21 = vpop.f32.mrf.mxu0 }
  0xb7   :  { %v172_v23 = vadd.f32 %v171_v21, %v106_v12 }
  0xb9   :  { %v197_v24 = vmax.f32 %v172_v23, 0.0 }
  0xbb   :  { %v207_v25 = vpack.c.bf16 %v197_v24, %v196_v22 }
  0xbd   :  { %291 = vmatmul.bf16.gmra.mxu1 %v207_v25 }
  0xbe   :  { %v174_v26 = vpop.f32.mrf.mxu0 }
  0xbf   :  { %v175_v27 = vadd.f32 %v174_v26, %v106_v12 }
  0xc1   :  { %v198_v29 = vmax.f32 %v175_v27, 0.0 }
  0xc6   :  { %v176_v28 = vpop.f32.mrf.mxu0 }
  0xc7   :  { %v177_v30 = vadd.f32 %v176_v28, %v106_v12  ;;  %v2317_v28 = vld [vmem:[%s2916_s3 + $0x78] sm:$0xff] }
  0xc8   :  { %535 = vmatpush.bf16.msra.mxu3 %v2317_v28  ;;  %v2362_v28 = vld [vmem:[%s2916_s3 + $0x1e0] sm:$0xff] }
  0xc9   :  { %v199_v31 = vmax.f32 %v177_v30, 0.0  ;;  %v2316_v30 = vld [vmem:[%s2916_s3 + $0x70] sm:$0xff] }
  0xcb   :  { %v208_v32 = vpack.c.bf16 %v199_v31, %v198_v29  ;;  %v2333_v31 = vld [vmem:[%s2916_s3 + $0xf8] sm:$0xff] }
  0xcc   :  { %755 = vmatpush.bf16.msrb.mxu0 %v2333_v31  ;;  %536 = vmatpush.bf16.msra.mxu3 %v2316_v30  ;;  %v2372_v30 = vld [vmem:[%s2916_s3 + $0x230] sm:$0xff] }
  0xcd   :  { %296 = vmatmul.bf16.gmra.mxu1 %v208_v32  ;;  %v2349_v32 = vld [vmem:[%s2916_s3 + $0x178] sm:$0xff] }
  0xce   :  { %v179_v33 = vpop.f32.mrf.mxu0  ;;  %915 = vmatpush.bf16.msrb.mxu2 %v2349_v32  ;;  %v2361_v32 = vld [vmem:[%s2916_s3 + $0x1d8] sm:$0xff] }
  0xcf   :  { %v180_v34 = vadd.f32 %v179_v33, %v106_v12 }
  0xd1   :  { %v200_v36 = vmax.f32 %v180_v34, 0.0  ;;  %v2315_v34 = vld [vmem:[%s2916_s3 + $0x68] sm:$0xff] }
  0xd2   :  { %537 = vmatpush.bf16.msra.mxu3 %v2315_v34  ;;  %916 = vmatpush.bf16.msrb.mxu2 %v2348_v60  ;;  %v2397_v60 = vld [vmem:[%s2916_s3 + $0x2f8] sm:$0xff] }
  0xd6   :  { %v181_v35 = vpop.f32.mrf.mxu0  ;;  %538 = vmatpush.bf16.msra.mxu3 %v2314_v40  ;;  %v2380_v40 = vld [vmem:[%s2916_s3 + $0x270] sm:$0xff] }
  0xd7   :  { %v182_v37 = vadd.f32 %v181_v35, %v106_v12  ;;  %v2341_v35 = vld [vmem:[%s2916_s3 + $0x138] sm:$0xff] }
  0xd8   :  { %835 = vmatpush.bf16.msrb.mxu1 %v2341_v35  ;;  %v2324_v35 = vld [vmem:[%s2916_s3 + $0xb0] sm:$0xff] }
  0xd9   :  { %v201_v38 = vmax.f32 %v182_v37, 0.0 }
  0xdb   :  { %v209_v39 = vpack.c.bf16 %v201_v38, %v200_v36  ;;  %v2332_v36 = vld [vmem:[%s2916_s3 + $0xf0] sm:$0xff] }
  0xdc   :  { %756 = vmatpush.bf16.msrb.mxu0 %v2332_v36  ;;  %836 = vmatpush.bf16.msrb.mxu1 %v2340_v61  ;;  %v2381_v36 = vld [vmem:[%s2916_s3 + $0x278] sm:$0xff] }
  0xdd   :  { %301 = vmatmul.bf16.gmra.mxu1 %v209_v39 }
  0xde   :  { %v184_v41 = vpop.f32.mrf.mxu0 }
  0xdf   :  { %v185_v43 = vadd.f32 %v184_v41, %v106_v12 }
  0xe1   :  { %v202_v46 = vmax.f32 %v185_v43, 0.0  ;;  %v2313_v43 = vld [vmem:[%s2916_s3 + $0x58] sm:$0xff] }
  0xe2   :  { %539 = vmatpush.bf16.msra.mxu3 %v2313_v43  ;;  %v2369_v43 = vld [vmem:[%s2916_s3 + $0x218] sm:$0xff] }
  0xe6   :  { %v186_v45 = vpop.f32.mrf.mxu0 }
  0xe7   :  { %v187_v47 = vadd.f32 %v186_v45, %v106_v12  ;;  %v2312_v45 = vld [vmem:[%s2916_s3 + $0x50] sm:$0xff] }
  0xe8   :  { %540 = vmatpush.bf16.msra.mxu3 %v2312_v45  ;;  %v2322_v45 = vld [vmem:[%s2916_s3 + $0xa0] sm:$0xff] }
  0xe9   :  { %v203_v49 = vmax.f32 %v187_v47, 0.0  ;;  %v2311_v47 = vld [vmem:[%s2916_s3 + $0x48] sm:$0xff] }
  0xeb   :  { %v210_v50 = vpack.c.bf16 %v203_v49, %v202_v46 }
  0xec   :  { %541 = vmatpush.bf16.msra.mxu3 %v2311_v47 }
  0xed   :  { %306 = vmatmul.bf16.gmra.mxu1 %v210_v50 }
  0xee   :  { %v189_v51 = vpop.f32.mrf.mxu0 }
  0xef   :  { %v190_v52 = vadd.f32 %v189_v51, %v106_v12  ;;  %v2310_v51 = vld [vmem:[%s2916_s3 + $0x40] sm:$0xff] }
  0xf0   :  { %542 = vmatpush.bf16.msra.mxu3 %v2310_v51  ;;  %v2368_v51 = vld [vmem:[%s2916_s3 + $0x210] sm:$0xff] }
  0xf1   :  { %v204_v54 = vmax.f32 %v190_v52, 0.0  ;;  %v2309_v52 = vld [vmem:[%s2916_s3 + $0x38] sm:$0xff] }
  0xf4   :  { %596 = vmatpush.bf16.msrb.mxu3 %v2309_v52  ;;  %v2321_v52 = vld [vmem:[%s2916_s3 + $0x98] sm:$0xff] }
  0xf6   :  { %v191_v53 = vpop.f32.mrf.mxu0 }
  0xf7   :  { %v192_v55 = vadd.f32 %v191_v53, %v106_v12 }
  0xf9   :  { %v205_v56 = vmax.f32 %v192_v55, 0.0  ;;  %v2308_v55 = vld [vmem:[%s2916_s3 + $0x30] sm:$0xff] }
  0xfa   :  { %597 = vmatpush.bf16.msrb.mxu3 %v2308_v55 }
  0xfb   :  { %v211_v57 = vpack.c.bf16 %v205_v56, %v204_v54  ;;  %v2307_v56 = vld [vmem:[%s2916_s3 + $0x28] sm:$0xff] }
  0xfd   :  { %311 = vmatmul.bf16.gmra.mxu1 %v211_v57  ;;  %v2306_v57 = vld [vmem:[%s2916_s3 + $0x20] sm:$0xff] }
  0xfe   :  { %598 = vmatpush.bf16.msrb.mxu3 %v2307_v56  ;;  %v2367_v56 = vld [vmem:[%s2916_s3 + $0x208] sm:$0xff] }
 0x102   :  { %599 = vmatpush.bf16.msrb.mxu3 %v2306_v57  ;;  %v2377_v57 = vld [vmem:[%s2916_s3 + $0x258] sm:$0xff] }
 0x106   :  { %600 = vmatpush.bf16.msrb.mxu3 %v2305_v58 }
 0x10a   :  { %601 = vmatpush.bf16.msrb.mxu3 %v2304_v59  ;;  %v2320_v59 = vld [vmem:[%s2916_s3 + $0x90] sm:$0xff] }
 0x12a   :  { %v287_v62 = vpop.f32.mrf.mxu1 }
 0x12b   :  { %v288_v0 = vadd.f32 %v287_v62, %v2561_v63  ;;  %v2331_v62 = vld [vmem:[%s2916_s3 + $0xe8] sm:$0xff] }
 0x12c   :  { %757 = vmatpush.bf16.msrb.mxu0 %v2331_v62 }
 0x12d   :  { %v317_v3 = vmax.f32 %v288_v0, 0.0  ;;  %v2330_v0 = vld [vmem:[%s2916_s3 + $0xe0] sm:$0xff] }
 0x130   :  { %758 = vmatpush.bf16.msrb.mxu0 %v2330_v0  ;;  %v2376_v0 = vld [vmem:[%s2916_s3 + $0x250] sm:$0xff] }
 0x132   :  { %v289_v1 = vpop.f32.mrf.mxu1 }
 0x133   :  { %v290_v2 = vadd.f32 %v289_v1, %v2561_v63  ;;  %v2302_v1 = vld [vmem:[%s2916_s3] sm:$0xff] }
 0x135   :  { %v318_v4 = vmax.f32 %v290_v2, 0.0  ;;  %v2347_v2 = vld [vmem:[%s2916_s3 + $0x168] sm:$0xff] }
 0x136   :  { %917 = vmatpush.bf16.msrb.mxu2 %v2347_v2  ;;  %v2396_v2 = vld [vmem:[%s2916_s3 + $0x2f0] sm:$0xff] }
 0x137   :  { %v329_v6 = vpack.c.bf16 %v318_v4, %v317_v3  ;;  %v2329_v3 = vld [vmem:[%s2916_s3 + $0xd8] sm:$0xff]  ;;  %v2339_v4 = vld [vmem:[%s2916_s3 + $0x128] sm:$0xff] }
 0x138   :  { %759 = vmatpush.bf16.msrb.mxu0 %v2329_v3  ;;  %837 = vmatpush.bf16.msrb.mxu1 %v2339_v4 }
 0x139   :  { %409 = vmatmul.bf16.vlgmr.msra.gmra.mxu2 %v329_v6  ;;  %v2328_v6 = vld [vmem:[%s2916_s3 + $0xd0] sm:$0xff] }
 0x13a   :  { %v292_v7 = vpop.f32.mrf.mxu1 }
 0x13b   :  { %v293_v8 = vadd.f32 %v292_v7, %v2561_v63  ;;  %v2338_v7 = vld [vmem:[%s2916_s3 + $0x120] sm:$0xff] }
 0x13c   :  { %760 = vmatpush.bf16.msrb.mxu0 %v2328_v6  ;;  %838 = vmatpush.bf16.msrb.mxu1 %v2338_v7  ;;  %v2375_v6 = vld [vmem:[%s2916_s3 + $0x248] sm:$0xff] }
 0x13d   :  { %v319_v10 = vmax.f32 %v293_v8, 0.0  ;;  %v2327_v8 = vld [vmem:[%s2916_s3 + $0xc8] sm:$0xff] }
 0x13e   :  { %v2395_v7 = vld [vmem:[%s2916_s3 + $0x2e8] sm:$0xff] }
 0x140   :  { %761 = vmatpush.bf16.msrb.mxu0 %v2327_v8 }
 0x142   :  { %v294_v9 = vpop.f32.mrf.mxu1 }
 0x143   :  { %v295_v11 = vadd.f32 %v294_v9, %v2561_v63  ;;  %v2337_v9 = vld [vmem:[%s2916_s3 + $0x118] sm:$0xff] }
 0x144   :  { %839 = vmatpush.bf16.msrb.mxu1 %v2337_v9  ;;  %v2318_v9 = vld [vmem:[%s2916_s3 + $0x80] sm:$0xff] }
 0x145   :  { %v320_v12 = vmax.f32 %v295_v11, 0.0  ;;  %v2326_v11 = vld [vmem:[%s2916_s3 + $0xc0] sm:$0xff] }
 0x146   :  { %762 = vmatpush.bf16.msrb.mxu0 %v2326_v11 }
 0x147   :  { %v330_v13 = vpack.c.bf16 %v320_v12, %v319_v10  ;;  %v2346_v10 = vld [vmem:[%s2916_s3 + $0x160] sm:$0xff]  ;;  %v2336_v12 = vld [vmem:[%s2916_s3 + $0x110] sm:$0xff] }
 0x148   :  { %918 = vmatpush.bf16.msrb.mxu2 %v2346_v10  ;;  %840 = vmatpush.bf16.msrb.mxu1 %v2336_v12  ;;  %v2357_v12 = vld [vmem:[%s2916_s3 + $0x1b8] sm:$0xff] }
 0x149   :  { %414 = vmatmul.bf16.gmra.mxu2 %v330_v13  ;;  %v2335_v13 = vld [vmem:[%s2916_s3 + $0x108] sm:$0xff] }
 0x14a   :  { %v297_v14 = vpop.f32.mrf.mxu1 }
 0x14b   :  { %v298_v15 = vadd.f32 %v297_v14, %v2561_v63  ;;  %v2345_v14 = vld [vmem:[%s2916_s3 + $0x158] sm:$0xff] }
 0x14c   :  { %919 = vmatpush.bf16.msrb.mxu2 %v2345_v14  ;;  %841 = vmatpush.bf16.msrb.mxu1 %v2335_v13  ;;  %v2374_v14 = vld [vmem:[%s2916_s3 + $0x240] sm:$0xff] }
 0x14d   :  { %v321_v17 = vmax.f32 %v298_v15, 0.0  ;;  %v2365_v15 = vld [vmem:[%s2916_s3 + $0x1f8] sm:$0xff] }
 0x14e   :  { %1075 = vmatpush.bf16.msra.mxu0 %v2365_v15  ;;  %v2394_v15 = vld [vmem:[%s2916_s3 + $0x2e0] sm:$0xff] }
 0x152   :  { %v299_v16 = vpop.f32.mrf.mxu1 }
 0x153   :  { %v300_v18 = vadd.f32 %v299_v16, %v2561_v63 }
 0x155   :  { %v322_v19 = vmax.f32 %v300_v18, 0.0  ;;  %v2344_v18 = vld [vmem:[%s2916_s3 + $0x150] sm:$0xff] }
 0x156   :  { %920 = vmatpush.bf16.msrb.mxu2 %v2344_v18  ;;  %v2356_v18 = vld [vmem:[%s2916_s3 + $0x1b0] sm:$0xff] }
 0x157   :  { %v331_v20 = vpack.c.bf16 %v322_v19, %v321_v17  ;;  %v2334_v17 = vld [vmem:[%s2916_s3 + $0x100] sm:$0xff]  ;;  %v2364_v19 = vld [vmem:[%s2916_s3 + $0x1f0] sm:$0xff] }
 0x158   :  { %1076 = vmatpush.bf16.msra.mxu0 %v2364_v19  ;;  %842 = vmatpush.bf16.msrb.mxu1 %v2334_v17 }
 0x159   :  { %419 = vmatmul.bf16.gmra.mxu2 %v331_v20  ;;  %v2696_v20 = vperm.slane %v2459_v5, 4 }
 0x15a   :  { %v302_v21 = vpop.f32.mrf.mxu1 }
 0x15b   :  { %v303_v22 = vadd.f32 %v302_v21, %v2561_v63  ;;  %v2343_v21 = vld [vmem:[%s2916_s3 + $0x148] sm:$0xff] }
 0x15c   :  { %921 = vmatpush.bf16.msrb.mxu2 %v2343_v21  ;;  %v2393_v21 = vld [vmem:[%s2916_s3 + $0x2d8] sm:$0xff] }
 0x15d   :  { %v323_v24 = vmax.f32 %v303_v22, 0.0  ;;  %v2363_v22 = vld [vmem:[%s2916_s3 + $0x1e8] sm:$0xff] }
 0x15e   :  { %1077 = vmatpush.bf16.msra.mxu0 %v2363_v22  ;;  %v2355_v22 = vld [vmem:[%s2916_s3 + $0x1a8] sm:$0xff] }
 0x162   :  { %v304_v23 = vpop.f32.mrf.mxu1  ;;  %1078 = vmatpush.bf16.msra.mxu0 %v2362_v28  ;;  %v2353_v28 = vld [vmem:[%s2916_s3 + $0x198] sm:$0xff] }
 0x163   :  { %v305_v25 = vadd.f32 %v304_v23, %v2561_v63  ;;  %v2373_v23 = vld [vmem:[%s2916_s3 + $0x238] sm:$0xff] }
 0x164   :  { %1155 = vmatpush.bf16.msra.mxu1 %v2373_v23  ;;  %v2392_v23 = vld [vmem:[%s2916_s3 + $0x2d0] sm:$0xff] }
 0x165   :  { %v324_v26 = vmax.f32 %v305_v25, 0.0 }
 0x166   :  { %1079 = vmatpush.bf16.msra.mxu0 %v2361_v32  ;;  %v2352_v32 = vld [vmem:[%s2916_s3 + $0x190] sm:$0xff] }
 0x167   :  { %v332_v27 = vpack.c.bf16 %v324_v26, %v323_v24 }
 0x168   :  { %1156 = vmatpush.bf16.msra.mxu1 %v2372_v30  ;;  %v2390_v30 = vld [vmem:[%s2916_s3 + $0x2c0] sm:$0xff] }
 0x169   :  { %424 = vmatmul.bf16.gmra.mxu2 %v332_v27  ;;  %v2342_v27 = vld [vmem:[%s2916_s3 + $0x140] sm:$0xff] }
 0x16a   :  { %v307_v29 = vpop.f32.mrf.mxu1  ;;  %922 = vmatpush.bf16.msrb.mxu2 %v2342_v27 }
 0x16b   :  { %v308_v33 = vadd.f32 %v307_v29, %v2561_v63  ;;  %v2325_v29 = vld [vmem:[%s2916_s3 + $0xb8] sm:$0xff] }
 0x16d   :  { %v325_v38 = vmax.f32 %v308_v33, 0.0  ;;  %v2371_v33 = vld [vmem:[%s2916_s3 + $0x228] sm:$0xff] }
 0x16e   :  { %1157 = vmatpush.bf16.msra.mxu1 %v2371_v33  ;;  %1235 = vmatpush.bf16.msra.mxu2 %v2381_v36 }
 0x172   :  { %v309_v37 = vpop.f32.mrf.mxu1  ;;  %1236 = vmatpush.bf16.msra.mxu2 %v2380_v40 }
 0x173   :  { %v310_v39 = vadd.f32 %v309_v37, %v2561_v63  ;;  %v2360_v37 = vld [vmem:[%s2916_s3 + $0x1d0] sm:$0xff] }
 0x174   :  { %1080 = vmatpush.bf16.msra.mxu0 %v2360_v37 }
 0x175   :  { %v326_v41 = vmax.f32 %v310_v39, 0.0  ;;  %v2323_v39 = vld [vmem:[%s2916_s3 + $0xa8] sm:$0xff] }
 0x177   :  { %v333_v42 = vpack.c.bf16 %v326_v41, %v325_v38  ;;  %v2370_v38 = vld [vmem:[%s2916_s3 + $0x220] sm:$0xff] }
 0x178   :  { %1158 = vmatpush.bf16.msra.mxu1 %v2370_v38 }
 0x179   :  { %429 = vmatmul.bf16.gmra.mxu2 %v333_v42  ;;  %v2359_v42 = vld [vmem:[%s2916_s3 + $0x1c8] sm:$0xff] }
 0x17a   :  { %v312_v44 = vpop.f32.mrf.mxu1  ;;  %1081 = vmatpush.bf16.msra.mxu0 %v2359_v42 }
 0x17b   :  { %v313_v46 = vadd.f32 %v312_v44, %v2561_v63 }
 0x17c   :  { %1159 = vmatpush.bf16.msra.mxu1 %v2369_v43 }
 0x17d   :  { %v327_v49 = vmax.f32 %v313_v46, 0.0  ;;  %v2379_v46 = vld [vmem:[%s2916_s3 + $0x268] sm:$0xff] }
 0x17e   :  { %1237 = vmatpush.bf16.msra.mxu2 %v2379_v46 }
 0x180   :  { %1160 = vmatpush.bf16.msra.mxu1 %v2368_v51  ;;  %v2385_v51 = vld [vmem:[%s2916_s3 + $0x298] sm:$0xff] }
 0x182   :  { %v314_v48 = vpop.f32.mrf.mxu1 }
 0x183   :  { %v315_v50 = vadd.f32 %v314_v48, %v2561_v63  ;;  %v2303_v63 = vld [vmem:[%s2916_s3 + $0x8] sm:$0xff] }
 0x184   :  { %602 = vmatpush.bf16.msrb.mxu3 %v2303_v63  ;;  %1161 = vmatpush.bf16.msra.mxu1 %v2367_v56  ;;  %v2366_v63 = vld [vmem:[%s2916_s3 + $0x200] sm:$0xff] }
 0x185   :  { %v328_v53 = vmax.f32 %v315_v50, 0.0  ;;  %v2358_v50 = vld [vmem:[%s2916_s3 + $0x1c0] sm:$0xff] }
 0x186   :  { %1082 = vmatpush.bf16.msra.mxu0 %v2358_v50  ;;  %v2386_v50 = vld [vmem:[%s2916_s3 + $0x2a0] sm:$0xff] }
 0x187   :  { %v334_v54 = vpack.c.bf16 %v328_v53, %v327_v49  ;;  %v2378_v53 = vld [vmem:[%s2916_s3 + $0x260] sm:$0xff] }
 0x188   :  { %603 = vmatpush.bf16.msrb.mxu3 %v2302_v1  ;;  %1238 = vmatpush.bf16.msra.mxu2 %v2378_v53  ;;  %v2319_v1 = vld [vmem:[%s2916_s3 + $0x88] sm:$0xff] }
 0x189   :  { %434 = vmatmul.bf16.gmra.mxu2 %v334_v54  ;;  %1162 = vmatpush.bf16.msra.mxu1 %v2366_v63 }
 0x18c   :  { %1239 = vmatpush.bf16.msra.mxu2 %v2377_v57  ;;  %v2383_v57 = vld [vmem:[%s2916_s3 + $0x288] sm:$0xff] }
 0x190   :  { %1240 = vmatpush.bf16.msra.mxu2 %v2376_v0 }
 0x194   :  { %1241 = vmatpush.bf16.msra.mxu2 %v2375_v6 }
 0x198   :  { %1242 = vmatpush.bf16.msra.mxu2 %v2374_v14 }
 0x1bc   :  { %v410_v16 = vpop.f32.mrf.mxu2 }
 0x1bd   :  { %v411_v41 = vadd.f32 %v410_v16, %v2696_v20 }
 0x1bf   :  { %v440_v47 = vmax.f32 %v411_v41, 0.0  ;;  %v2389_v41 = vld [vmem:[%s2916_s3 + $0x2b8] sm:$0xff] }
 0x1c1   :  { %v452_v54 = vpack.c.bf16 %v440_v47, %v440_v47 }
 0x1c4   :  { %v412_v24 = vpop.f32.mrf.mxu2 }
 0x1c5   :  { %v413_v25 = vadd.f32 %v412_v24, %v2696_v20  ;;  %v2354_v24 = vld [vmem:[%s2916_s3 + $0x1a0] sm:$0xff] }
 0x1c7   :  { %v441_v26 = vmax.f32 %v413_v25, 0.0 }
 0x1c9   :  { %v469_v31 = vpack.c.bf16 %v441_v26, %v441_v26  ;;  %v2391_v26 = vld [vmem:[%s2916_s3 + $0x2c8] sm:$0xff] }
 0x1cb   :  { %543 = vmatmul.bf16.vlgmr.msra.gmra.mxu3 %v469_v31 }
 0x1cc   :  { %675 = vmatpush.bf16.msra.mxu3 %v2325_v29  ;;  %v415_v34 = vpop.f32.mrf.mxu2 }
 0x1cd   :  { %v416_v3 = vadd.f32 %v415_v34, %v2696_v20 }
 0x1cf   :  { %v442_v10 = vmax.f32 %v416_v3, 0.0 }
 0x1d0   :  { %676 = vmatpush.bf16.msra.mxu3 %v2324_v35  ;;  %v2351_v35 = vld [vmem:[%s2916_s3 + $0x188] sm:$0xff] }
 0x1d1   :  { %v609_v16 = vpack.c.bf16 %v442_v10, %v442_v10 }
 0x1d4   :  { %677 = vmatpush.bf16.msra.mxu3 %v2323_v39  ;;  %v417_v44 = vpop.f32.mrf.mxu2  ;;  %v2350_v39 = vld [vmem:[%s2916_s3 + $0x180] sm:$0xff] }
 0x1d5   :  { %v418_v48 = vadd.f32 %v417_v44, %v2696_v20 }
 0x1d7   :  { %v443_v49 = vmax.f32 %v418_v48, 0.0  ;;  %v2387_v48 = vld [vmem:[%s2916_s3 + $0x2a8] sm:$0xff] }
 0x1d8   :  { %678 = vmatpush.bf16.msra.mxu3 %v2322_v45  ;;  %v2388_v45 = vld [vmem:[%s2916_s3 + $0x2b0] sm:$0xff] }
 0x1d9   :  { %v689_v55 = vpack.c.bf16 %v443_v49, %v443_v49 }
 0x1db   :  { %604 = vmatmul.bf16.vlgmr.msrb.gmra.mxu3 %v452_v54  ;;  %763 = vmatmul.bf16.vlgmr.msrb.gmra.mxu0 %v689_v55  ;;  %v2384_v54 = vld [vmem:[%s2916_s3 + $0x290] sm:$0xff] }
 0x1dc   :  { %679 = vmatpush.bf16.msra.mxu3 %v2321_v52  ;;  %v420_v58 = vpop.f32.mrf.mxu2  ;;  %1395 = vmatpush.bf16.msrb.mxu0 %v2397_v60 }
 0x1dd   :  { %v421_v61 = vadd.f32 %v420_v58, %v2696_v20 }
 0x1df   :  { %v444_v62 = vmax.f32 %v421_v61, 0.0 }
 0x1e0   :  { %680 = vmatpush.bf16.msra.mxu3 %v2320_v59  ;;  %1396 = vmatpush.bf16.msrb.mxu0 %v2396_v2  ;;  %v2382_v59 = vld [vmem:[%s2916_s3 + $0x280] sm:$0xff] }
 0x1e1   :  { %v769_v4 = vpack.c.bf16 %v444_v62, %v444_v62 }
 0x1e3   :  { %843 = vmatmul.bf16.vlgmr.msrb.gmra.mxu1 %v769_v4 }
 0x1e4   :  { %681 = vmatpush.bf16.msra.mxu3 %v2319_v1  ;;  %v422_v8 = vpop.f32.mrf.mxu2  ;;  %1397 = vmatpush.bf16.msrb.mxu0 %v2395_v7 }
 0x1e5   :  { %v423_v11 = vadd.f32 %v422_v8, %v2696_v20 }
 0x1e7   :  { %v445_v13 = vmax.f32 %v423_v11, 0.0 }
 0x1e8   :  { %682 = vmatpush.bf16.msra.mxu3 %v2318_v9  ;;  %1398 = vmatpush.bf16.msrb.mxu0 %v2394_v15 }
 0x1e9   :  { %v849_v17 = vpack.c.bf16 %v445_v13, %v445_v13 }
 0x1eb   :  { %683 = vmatmul.bf16.vlgmr.msra.gmra.mxu3 %v609_v16  ;;  %923 = vmatmul.bf16.vlgmr.msrb.gmra.mxu2 %v849_v17 }
 0x1ec   :  { %995 = vmatpush.bf16.msrb.mxu3 %v2357_v12  ;;  %v425_v19 = vpop.f32.mrf.mxu2  ;;  %1399 = vmatpush.bf16.msrb.mxu0 %v2393_v21 }
 0x1ed   :  { %v426_v36 = vadd.f32 %v425_v19, %v2696_v20 }
 0x1ef   :  { %v446_v40 = vmax.f32 %v426_v36, 0.0 }
 0x1f0   :  { %996 = vmatpush.bf16.msrb.mxu3 %v2356_v18  ;;  %1400 = vmatpush.bf16.msrb.mxu0 %v2392_v23 }
 0x1f1   :  { %v929_v44 = vpack.c.bf16 %v446_v40, %v446_v40 }
 0x1f4   :  { %997 = vmatpush.bf16.msrb.mxu3 %v2355_v22  ;;  %v427_v25 = vpop.f32.mrf.mxu2  ;;  %1401 = vmatpush.bf16.msrb.mxu0 %v2391_v26 }
 0x1f5   :  { %v428_v27 = vadd.f32 %v427_v25, %v2696_v20 }
 0x1f7   :  { %v447_v29 = vmax.f32 %v428_v27, 0.0 }
 0x1f8   :  { %998 = vmatpush.bf16.msrb.mxu3 %v2354_v24  ;;  %1402 = vmatpush.bf16.msrb.mxu0 %v2390_v30 }
 0x1f9   :  { %v1009_v31 = vpack.c.bf16 %v447_v29, %v447_v29 }
 0x1fb   :  { %1083 = vmatmul.bf16.vlgmr.msra.gmra.mxu0 %v1009_v31 }
 0x1fc   :  { %999 = vmatpush.bf16.msrb.mxu3 %v2353_v28  ;;  %v430_v33 = vpop.f32.mrf.mxu2 }
 0x1fd   :  { %v431_v34 = vadd.f32 %v430_v33, %v2696_v20 }
 0x1ff   :  { %v448_v37 = vmax.f32 %v431_v34, 0.0 }
 0x200   :  { %1000 = vmatpush.bf16.msrb.mxu3 %v2352_v32  ;;  %v1409_v32 = vperm.slane %v2459_v5, 5  ;;  %v2405_v5 = vld [vmem:[%s2912_s2 + $0xf8] sm:$0xff] }
 0x201   :  { %v1089_v38 = vpack.c.bf16 %v448_v37, %v448_v37  ;;  %1513 = vmatpush.bf16.msrb.mxu1 %v2405_v5 }
 0x203   :  { %1163 = vmatmul.bf16.vlgmr.msra.gmra.mxu1 %v1089_v38 }
 0x204   :  { %1001 = vmatpush.bf16.msrb.mxu3 %v2351_v35  ;;  %v432_v42 = vpop.f32.mrf.mxu2 }
 0x205   :  { %v433_v43 = vadd.f32 %v432_v42, %v2696_v20 }
 0x207   :  { %v449_v46 = vmax.f32 %v433_v43, 0.0 }
 0x208   :  { %1002 = vmatpush.bf16.msrb.mxu3 %v2350_v39 }
 0x209   :  { %v1169_v47 = vpack.c.bf16 %v449_v46, %v449_v46  ;;  %v2404_v46 = vld [vmem:[%s2912_s2 + $0xf0] sm:$0xff] }
 0x20a   :  { %1514 = vmatpush.bf16.msrb.mxu1 %v2404_v46 }
 0x20b   :  { %1003 = vmatmul.bf16.vlgmr.msrb.gmra.mxu3 %v929_v44  ;;  %1243 = vmatmul.bf16.vlgmr.msra.gmra.mxu2 %v1169_v47  ;;  %v2403_v47 = vld [vmem:[%s2912_s2 + $0xe8] sm:$0xff] }
 0x20c   :  { %1315 = vmatpush.bf16.msra.mxu3 %v2389_v41  ;;  %v435_v49 = vpop.f32.mrf.mxu2 }
 0x20d   :  { %v436_v58 = vadd.f32 %v435_v49, %v2696_v20  ;;  %v2401_v49 = vld [vmem:[%s2912_s2 + $0xd8] sm:$0xff] }
 0x20e   :  { %1515 = vmatpush.bf16.msrb.mxu1 %v2403_v47 }
 0x20f   :  { %v450_v60 = vmax.f32 %v436_v58, 0.0 }
 0x210   :  { %1316 = vmatpush.bf16.msra.mxu3 %v2388_v45 }
 0x211   :  { %v1249_v61 = vpack.c.bf16 %v450_v60, %v450_v60 }
 0x214   :  { %1317 = vmatpush.bf16.msra.mxu3 %v2387_v48  ;;  %v437_v52 = vpop.f32.mrf.mxu2  ;;  %v2402_v48 = vld [vmem:[%s2912_s2 + $0xe0] sm:$0xff] }
 0x215   :  { %v438_v53 = vadd.f32 %v437_v52, %v2696_v20  ;;  %1516 = vmatpush.bf16.msrb.mxu1 %v2402_v48  ;;  %v2399_v52 = vld [vmem:[%s2912_s2 + $0xc8] sm:$0xff] }
 0x217   :  { %v451_v55 = vmax.f32 %v438_v53, 0.0  ;;  %v2398_v53 = vld [vmem:[%s2912_s2 + $0xc0] sm:$0xff] }
 0x218   :  { %1318 = vmatpush.bf16.msra.mxu3 %v2386_v50  ;;  %v2400_v50 = vld [vmem:[%s2912_s2 + $0xd0] sm:$0xff] }
 0x219   :  { %v1329_v56 = vpack.c.bf16 %v451_v55, %v451_v55  ;;  %1517 = vmatpush.bf16.msrb.mxu1 %v2401_v49 }
 0x21b   :  { %1403 = vmatmul.bf16.vlgmr.msrb.gmra.mxu0 %v1329_v56 }
 0x21c   :  { %1319 = vmatpush.bf16.msra.mxu3 %v2385_v51 }
 0x21d   :  { %1518 = vmatpush.bf16.msrb.mxu1 %v2400_v50 }
 0x220   :  { %1320 = vmatpush.bf16.msra.mxu3 %v2384_v54 }
 0x221   :  { %1519 = vmatpush.bf16.msrb.mxu1 %v2399_v52 }
 0x224   :  { %1321 = vmatpush.bf16.msra.mxu3 %v2383_v57 }
 0x225   :  { %1520 = vmatpush.bf16.msrb.mxu1 %v2398_v53 }
 0x228   :  { %1322 = vmatpush.bf16.msra.mxu3 %v2382_v59 }
 0x22b   :  { %1323 = vmatmul.bf16.vlgmr.msra.gmra.mxu3 %v1249_v61 }
 0x24e   :  { %v544_v62 = vpop.f32.mrf.mxu3 }
 0x256   :  { %v546_v63 = vpop.f32.mrf.mxu3 }
 0x258   :  { %v764_v0 = vpop.f32.mrf.mxu0 }
 0x25e   :  { %v605_v1 = vpop.f32.mrf.mxu3 }
 0x25f   :  { %v606_v7 = vadd.f32 %v605_v1, %v544_v62 }
 0x260   :  { %v766_v2 = vpop.f32.mrf.mxu0  ;;  %v844_v3 = vpop.f32.mrf.mxu1 }
 0x266   :  { %v607_v4 = vpop.f32.mrf.mxu3 }
 0x268   :  { %v846_v6 = vpop.f32.mrf.mxu1 }
 0x26e   :  { %v684_v20 = vpop.f32.mrf.mxu3  ;;  %v924_v8 = vpop.f32.mrf.mxu2 }
 0x26f   :  { %v688_v9 = vadd.f32 %v684_v20, %v606_v7 }
 0x271   :  { %v768_v10 = vadd.f32 %v764_v0, %v688_v9 }
 0x273   :  { %v848_v21 = vadd.f32 %v844_v3, %v768_v10  ;;  %v2410_v3 = vld [vmem:[%s2913_s4] sm:$0xff] }
 0x274   :  { %v1442_v4 = vperm.slane %v2410_v3, 6  ;;  %v1444_v20 = vperm.slane %v2410_v3, 7 }
 0x275   :  { %v928_v24 = vadd.f32 %v924_v8, %v848_v21 }
 0x276   :  { %v686_v11 = vpop.f32.mrf.mxu3  ;;  %v926_v12 = vpop.f32.mrf.mxu2 }
 0x277   :  { %v21_v11 = vld [vmem:[%s2913_s4 + $0x8] sm:$0xff] }
 0x278   :  { %v1084_v13 = vpop.f32.mrf.mxu0  ;;  %v1464_v12 = vperm.slane %v21_v11, 0 }
 0x280   :  { %v1086_v14 = vpop.f32.mrf.mxu0  ;;  %v1164_v15 = vpop.f32.mrf.mxu1 }
 0x288   :  { %v1166_v16 = vpop.f32.mrf.mxu1 }
 0x28e   :  { %v1004_v17 = vpop.f32.mrf.mxu3  ;;  %v1244_v18 = vpop.f32.mrf.mxu2 }
 0x28f   :  { %v1008_v25 = vadd.f32 %v1004_v17, %v928_v24 }
 0x291   :  { %v1088_v26 = vadd.f32 %v1084_v13, %v1008_v25 }
 0x293   :  { %v1168_v28 = vadd.f32 %v1164_v15, %v1088_v26 }
 0x295   :  { %v1248_v29 = vadd.f32 %v1244_v18, %v1168_v28 }
 0x296   :  { %v1006_v19 = vpop.f32.mrf.mxu3  ;;  %v1246_v22 = vpop.f32.mrf.mxu2 }
 0x298   :  { %v1404_v23 = vpop.f32.mrf.mxu0 }
 0x2a0   :  { %v1406_v27 = vpop.f32.mrf.mxu0 }
 0x2ae   :  { %v1324_v30 = vpop.f32.mrf.mxu3 }
 0x2af   :  { %v1328_v31 = vadd.f32 %v1324_v30, %v1248_v29 }
 0x2b1   :  { %v1408_v33 = vadd.f32 %v1404_v23, %v1328_v31 }
 0x2b3   :  { %v1410_v34 = vadd.f32 %v1409_v32, %v1408_v33 }
 0x2b5   :  { %v1412_v35 = vmul.f32 0.044715, %v1410_v34  ;;  %v1411_v42 = vmul.f32 0.5, %v1410_v34 }
 0x2b6   :  { %v1326_v36 = vpop.f32.mrf.mxu3 }
 0x2b7   :  { %v1413_v37 = vmul.f32 %v1412_v35, %v1410_v34 }
 0x2b9   :  { %v1414_v38 = vmul.f32 %v1413_v37, %v1410_v34 }
 0x2bb   :  { %v1415_v39 = vadd.f32 %v1414_v38, %v1410_v34 }
 0x2bd   :  { %v1416_v40 = vmul.f32 0.7978846, %v1415_v39 }
 0x2bf   :  { %2406 = vtanh.f32 %v1416_v40 }
 0x2c5   :  { %v2407_v41 = vpop.eup %2406 }
 0x2c6   :  { %v1418_v43 = vadd.f32 1.0, %v2407_v41 }
 0x2c8   :  { %v1419_v44 = vmul.f32 %v1418_v43, %v1411_v42 }
 0x2ca   :  { %1420 = vadd.xlane.f32.xlu0 %v1419_v44  ;;  %v1423_v45 = vmul.f32 %v1419_v44, %v1419_v44 }
 0x2d2   :  { %1424 = vadd.xlane.f32.xlu0 %v1423_v45 }
 0x33d   :  { %v1421_v51 = vpop.xlane.xlu0 %1420 }
 0x33e   :  { %v1422_v54 = vmul.f32 0.010416667, %v1421_v51 }
 0x340   :  { %v1427_v56 = vmul.f32 %v1422_v54, %v1422_v54  ;;  %v1429_v2 = vsub.f32 %v1419_v44, %v1422_v54 }
 0x345   :  { %v1425_v55 = vpop.xlane.xlu0 %1424 }
 0x346   :  { %v1426_v57 = vmul.f32 0.010416667, %v1425_v55 }
 0x348   :  { %v1428_v58 = vsub.f32 %v1426_v57, %v1427_v56 }
 0x34a   :  { %v1430_v59 = vadd.f32 1e-12, %v1428_v58 }
 0x34c   :  { %2408 = vrsqrt.f32 %v1430_v59  ;;  %vm1437_vm1 = vweird.f32 %v1430_v59 }
 0x352   :  { %v2409_v60 = vpop.eup %2408 }
 0x353   :  { %v1432_v61 = vmul.f32 %v2409_v60, %v1430_v59  ;;  %vm1438_vm0 = vweird.f32 %v2409_v60 }
 0x354   :  { %vm1439_vm2 = vmor %vm1437_vm1, %vm1438_vm0 }
 0x355   :  { %v1433_v62 = vmul.f32 %v2409_v60, %v1432_v61 }
 0x357   :  { %v1434_v63 = vmul.f32 0.5, %v1433_v62 }
 0x359   :  { %v1435_v0 = vsub.f32 1.5, %v1434_v63 }
 0x35b   :  { %v1436_v1 = vmul.f32 %v2409_v60, %v1435_v0 }
 0x35d   :  { %v1440_v6 = vsel %vm1439_vm2, %v2409_v60, %v1436_v1 }
 0x35e   :  { %v1441_v7 = vmul.f32 %v1440_v6, %v1429_v2 }
 0x360   :  { %v1443_v8 = vmul.f32 %v1442_v4, %v1441_v7 }
 0x362   :  { %v1445_v9 = vadd.f32 %v1444_v20, %v1443_v8 }
 0x364   :  { %v1446_v10 = vpack.c.bf16 %v1445_v9, %v1445_v9 }
 0x366   :  { %1521 = vmatmul.bf16.vlgmr.msrb.gmra.mxu1 %v1446_v10 }
 0x3e3   :  { %v1522_v13 = vpop.f32.mrf.mxu1 }
 0x3e4   :  { %v1523_v14 = vadd.f32 %v1522_v13, %v1464_v12 }
 0x3e6   :  { %1526 = vst [vmem:[%s2917_s5] sm:$0xff] %v1523_v14 }
 0x3eb   :  { %v1524_v15 = vpop.f32.mrf.mxu1 }

</bundles_post_ra>
